<compile_context>
chip_gen: v5e
topology: v5e:2x2
jax: 0.10.0
libtpu: 0.0.40
codegen_flags: <defaults>
</compile_context>

<pallas_src>
import functools

import jax
import jax.numpy as jnp
from jax import lax
from jax.experimental import pallas as pl
from jax.experimental.pallas import tpu as pltpu


# ----------------------------------------------------------------------------
# In-kernel helpers
# ----------------------------------------------------------------------------

def _ln(x, g, b, eps):
    """LayerNorm over the last axis; x:(M,H)  g,b:(1,H)."""
    mu = jnp.mean(x, axis=-1, keepdims=True)
    var = jnp.mean((x - mu) ** 2, axis=-1, keepdims=True)
    return (x - mu) * lax.rsqrt(var + eps) * g + b


def _gelu(x):
    # TODO(synk): tanh-approximate GELU; HuggingFace BERT default is exact erf
    # ("gelu"), expect ~1e-3 deviations in FFN activations vs that reference.
    return 0.5 * x * (1.0 + jnp.tanh(0.7978845608028654 * (x + 0.044715 * x * x * x)))


# ----------------------------------------------------------------------------
# Fused whole-model kernel: grid = (batch, layer)
# ----------------------------------------------------------------------------

def _model_kernel(we_ref, pe_ref, te_ref, mask_ref, eg_ref, eb_ref,
                  wqkv_ref, bqkv_ref, wo_ref, bo_ref, ln1g_ref, ln1b_ref,
                  w1_ref, b1_ref, w2_ref, b2_ref, ln2g_ref, ln2b_ref,
                  md_ref,
                  po_w_ref, po_b_ref,
                  me_w1_ref, me_b1_ref, me_w2_ref, me_b2_ref,
                  fu_wk_ref, fu_wm_ref, fu_b_ref,
                  de_w_ref, de_b_ref,
                  co_w_ref, co_b_ref,
                  wt_w_ref, wt_b_ref,
                  out_ref, x_scr, *, num_heads, eps):
    """One (batch-element, transformer-layer) pair per grid step.

    x_scr (S, H) carries activations across the layer axis for the current
    batch element.  Layer 0 also builds the embeddings + embedding LayerNorm;
    the last layer also runs the pooler + metadata MLP + fusion + dense +
    coord / softmax-weight heads and writes one lane-dense output row.
    """
    S, H = x_scr.shape
    dh = H // num_heads
    scale = 1.0 / float(dh) ** 0.5
    layer = pl.program_id(1)

    # ---- layer 0: embeddings (word + pos + type) -> embedding LayerNorm ----
    @pl.when(layer == 0)
    def _():
        x0 = we_ref[0].astype(jnp.float32) + pe_ref[...] + te_ref[...]
        x_scr[...] = _ln(x0, eg_ref[...], eb_ref[...], eps)

    x = x_scr[...]                                                 # (S, H)

    # additive attention bias from the raw int mask (tiny (1,S) VPU op)
    bias = (1.0 - mask_ref[0].astype(jnp.float32)) * -1e9          # (1, S)

    # fused QKV projection: (S, H) @ (H, 3H)
    qkv = jnp.dot(x, wqkv_ref[0], preferred_element_type=jnp.float32) + bqkv_ref[0]

    wo = wo_ref[0]                                                 # (H, H)

    # self-attention per head; head-concat folded into the output projection.
    # NOTE: fine fully unrolled at num_heads=2; use lax.fori_loop(unroll=True)
    # if num_heads grows.
    ctx_proj = None
    for h in range(num_heads):
        c0 = h * dh
        qh = qkv[:, c0:c0 + dh]                                    # (S, dh)
        kh = qkv[:, H + c0:H + c0 + dh]
        vh = qkv[:, 2 * H + c0:2 * H + c0 + dh]
        # Q.K^T with the contraction on dh (no explicit transpose)
        s = lax.dot_general(qh, kh, (((1,), (1,)), ((), ())),
                            preferred_element_type=jnp.float32) * scale
        s = s + bias                                               # (S, S)
        m = jnp.max(s, axis=-1, keepdims=True)
        p = jnp.exp(s - m)
        p = p / jnp.sum(p, axis=-1, keepdims=True)                 # exact softmax
        ctx_h = jnp.dot(p, vh, preferred_element_type=jnp.float32)  # (S, dh)
        part = jnp.dot(ctx_h, wo[c0:c0 + dh, :],
                       preferred_element_type=jnp.float32)          # (S, H)
        ctx_proj = part if ctx_proj is None else ctx_proj + part

    attn = ctx_proj + bo_ref[0]

    # attention residual + LN1
    x1 = _ln(attn + x, ln1g_ref[0], ln1b_ref[0], eps)

    # FFN + residual + LN2
    hmid = _gelu(jnp.dot(x1, w1_ref[0], preferred_element_type=jnp.float32) + b1_ref[0])
    ff = jnp.dot(hmid, w2_ref[0], preferred_element_type=jnp.float32) + b2_ref[0]
    x2 = _ln(ff + x1, ln2g_ref[0], ln2b_ref[0], eps)

    x_scr[...] = x2

    # ---- last layer: fused pooler + metadata MLP + fusion + heads ----------
    @pl.when(layer == pl.num_programs(1) - 1)
    def _():
        cls = x2[0:1, :]                                           # [CLS] row
        pooled = jnp.tanh(jnp.dot(cls, po_w_ref[...],
                                  preferred_element_type=jnp.float32) + po_b_ref[...])

        md = md_ref[0].astype(jnp.float32)                          # (1, MD)
        hmd = jnp.maximum(
            jnp.dot(md, me_w1_ref[...], preferred_element_type=jnp.float32)
            + me_b1_ref[...], 0.0)
        md_emb = (jnp.dot(hmd, me_w2_ref[...], preferred_element_type=jnp.float32)
                  + me_b2_ref[...])

        # cat([pooled, md_emb]) @ W_fusion == pooled @ W[:H] + md_emb @ W[H:]
        fused = (jnp.dot(pooled, fu_wk_ref[...], preferred_element_type=jnp.float32)
                 + jnp.dot(md_emb, fu_wm_ref[...], preferred_element_type=jnp.float32)
                 + fu_b_ref[...])

        dense = (jnp.dot(fused, de_w_ref[...], preferred_element_type=jnp.float32)
                 + de_b_ref[...])

        coords = (jnp.dot(dense, co_w_ref[...], preferred_element_type=jnp.float32)
                  + co_b_ref[...])                                  # (1, 2P)

        logits = (jnp.dot(dense, wt_w_ref[...], preferred_element_type=jnp.float32)
                  + wt_b_ref[...])                                  # (1, P)
        mw = jnp.max(logits, axis=-1, keepdims=True)
        ew = jnp.exp(logits - mw)
        wts = ew / jnp.sum(ew, axis=-1, keepdims=True)              # exact softmax

        # single lane-dense store: [coords(2P) | weights(P)]
        out_ref[0] = jnp.concatenate([coords, wts], axis=-1).astype(out_ref.dtype)


# ----------------------------------------------------------------------------
# Full model forward (matches MultitaskBERTModel.forward)
# ----------------------------------------------------------------------------

def _bspec2(shape):
    return pl.BlockSpec(shape, lambda b, l: (0, 0))


def _bspec_batch3(shape):
    return pl.BlockSpec(shape, lambda b, l: (b, 0, 0))


def _bspec_layer3(shape):
    return pl.BlockSpec(shape, lambda b, l: (l, 0, 0))


def multitask_bert_forward(params, kf_input, kf_mask, metadata,
                           *, num_heads, num_preds):
    bert = params["bert"]
    head = params["head"]
    B, S = kf_input.shape
    H = bert["word_emb"].shape[1]
    I = bert["w1"].shape[-1]
    L = bert["wqkv"].shape[0]
    MD = metadata.shape[-1]
    HD = head["me_w1"].shape[-1]
    P = num_preds

    # TODO(synk): embedding row gather kept in plain JAX (data-dependent
    # gather; not worth a manual DMA-gather kernel at this size).
    we = bert["word_emb"][kf_input]                         # (B, S, H)
    pe = bert["pos_emb"][:S]                                # (S, H)
    te = bert["type_emb"][0:1]                              # (1, H) token_type_ids == 0
    mask3 = kf_mask.astype(jnp.int32).reshape(B, 1, S)      # (B, 1, S)
    md3 = metadata.astype(jnp.float32).reshape(B, 1, MD)    # (B, 1, MD)

    out3 = pl.pallas_call(
        functools.partial(_model_kernel, num_heads=num_heads, eps=1e-12),
        out_shape=jax.ShapeDtypeStruct((B, 1, 3 * P), jnp.float32),
        grid=(B, L),
        in_specs=[
            _bspec_batch3((1, S, H)),      # word embeddings (gathered)
            _bspec2((S, H)),               # position embeddings
            _bspec2((1, H)),               # type embedding (token type 0)
            _bspec_batch3((1, 1, S)),      # attention mask (raw int)
            _bspec2((1, H)),               # emb LN gamma
            _bspec2((1, H)),               # emb LN beta
            _bspec_layer3((1, H, 3 * H)),  # wqkv
            _bspec_layer3((1, 1, 3 * H)),  # bqkv
            _bspec_layer3((1, H, H)),      # wo
            _bspec_layer3((1, 1, H)),      # bo
            _bspec_layer3((1, 1, H)),      # ln1 gamma
            _bspec_layer3((1, 1, H)),      # ln1 beta
            _bspec_layer3((1, H, I)),      # w1
            _bspec_layer3((1, 1, I)),      # b1
            _bspec_layer3((1, I, H)),      # w2
            _bspec_layer3((1, 1, H)),      # b2
            _bspec_layer3((1, 1, H)),      # ln2 gamma
            _bspec_layer3((1, 1, H)),      # ln2 beta
            _bspec_batch3((1, 1, MD)),     # metadata
            _bspec2((H, H)),               # pooler W
            _bspec2((1, H)),               # pooler b
            _bspec2((MD, HD)),             # metadata MLP W1
            _bspec2((1, HD)),              # metadata MLP b1
            _bspec2((HD, HD)),             # metadata MLP W2
            _bspec2((1, HD)),              # metadata MLP b2
            _bspec2((H, HD)),              # fusion W (BERT half)
            _bspec2((HD, HD)),             # fusion W (metadata half)
            _bspec2((1, HD)),              # fusion b
            _bspec2((HD, HD)),             # dense W
            _bspec2((1, HD)),              # dense b
            _bspec2((HD, 2 * P)),          # coord W
            _bspec2((1, 2 * P)),           # coord b
            _bspec2((HD, P)),              # weight W
            _bspec2((1, P)),               # weight b
        ],
        out_specs=pl.BlockSpec((1, 1, 3 * P), lambda b, l: (b, 0, 0)),
        scratch_shapes=[pltpu.VMEM((S, H), jnp.float32)],
        compiler_params=pltpu.CompilerParams(
            dimension_semantics=("parallel", "arbitrary")),
    )(we, pe, te, mask3,
      bert["emb_ln_g"].reshape(1, H), bert["emb_ln_b"].reshape(1, H),
      bert["wqkv"], bert["bqkv"], bert["wo"], bert["bo"],
      bert["ln1_g"], bert["ln1_b"],
      bert["w1"], bert["b1"], bert["w2"], bert["b2"],
      bert["ln2_g"], bert["ln2_b"],
      md3,
      bert["pool_w"], bert["pool_b"].reshape(1, H),
      head["me_w1"], head["me_b1"].reshape(1, HD),
      head["me_w2"], head["me_b2"].reshape(1, HD),
      head["fu_wk"], head["fu_wm"], head["fu_b"].reshape(1, HD),
      head["de_w"], head["de_b"].reshape(1, HD),
      head["co_w"], head["co_b"].reshape(1, 2 * P),
      head["wt_w"], head["wt_b"].reshape(1, P))

    # trivial final assembly: (B, 3P) -> (B, P, 3)   (coords | softmax weight)
    flat = out3.reshape(B, 3 * P)
    coords = flat[:, :2 * P].reshape(B, P, 2)
    weights = flat[:, 2 * P:]
    return jnp.concatenate([coords, weights[..., None]], axis=-1)


# ----------------------------------------------------------------------------
# Deterministic parameter construction (stacked per-layer weights)
# ----------------------------------------------------------------------------

def init_params(key, *, vocab=100, max_pos=16, bert_hidden=32, num_layers=2,
                intermediate=64, metadata_dim=6, hidden_dim=32, num_preds=5):
    keys = iter(jax.random.split(key, 64))

    def w(shape, scale=0.02):
        return jax.random.normal(next(keys), shape, jnp.float32) * scale

    H, I, L = bert_hidden, intermediate, num_layers

    bert = dict(
        word_emb=w((vocab, H)),
        pos_emb=w((max_pos, H)),
        type_emb=w((2, H)),
        emb_ln_g=jnp.ones((H,), jnp.float32), emb_ln_b=jnp.zeros((H,), jnp.float32),
        # stacked per-layer weights (leading layer axis, selected via index_map)
        wqkv=w((L, H, 3 * H)), bqkv=jnp.zeros((L, 1, 3 * H), jnp.float32),
        wo=w((L, H, H)), bo=jnp.zeros((L, 1, H), jnp.float32),
        ln1_g=jnp.ones((L, 1, H), jnp.float32), ln1_b=jnp.zeros((L, 1, H), jnp.float32),
        w1=w((L, H, I)), b1=jnp.zeros((L, 1, I), jnp.float32),
        w2=w((L, I, H)), b2=jnp.zeros((L, 1, H), jnp.float32),
        ln2_g=jnp.ones((L, 1, H), jnp.float32), ln2_b=jnp.zeros((L, 1, H), jnp.float32),
        pool_w=w((H, H)), pool_b=jnp.zeros((H,), jnp.float32),
    )

    fusion_w = w((H + hidden_dim, hidden_dim))
    head = dict(
        me_w1=w((metadata_dim, hidden_dim)), me_b1=jnp.zeros((hidden_dim,), jnp.float32),
        me_w2=w((hidden_dim, hidden_dim)), me_b2=jnp.zeros((hidden_dim,), jnp.float32),
        fu_wk=fusion_w[:H], fu_wm=fusion_w[H:],
        fu_b=jnp.zeros((hidden_dim,), jnp.float32),
        de_w=w((hidden_dim, hidden_dim)), de_b=jnp.zeros((hidden_dim,), jnp.float32),
        co_w=w((hidden_dim, num_preds * 2)), co_b=jnp.zeros((num_preds * 2,), jnp.float32),
        wt_w=w((hidden_dim, num_preds)), wt_b=jnp.zeros((num_preds,), jnp.float32),
    )
    return dict(bert=bert, head=head)


# ----------------------------------------------------------------------------
# Main
# ----------------------------------------------------------------------------

if __name__ == "__main__":
    B, S = 2, 8
    VOCAB = 100
    METADATA_DIM = 6
    NUM_PREDS = 5
    NUM_HEADS = 2

    key = jax.random.PRNGKey(0)
    k_params, k_ids, k_meta = jax.random.split(key, 3)

    params = init_params(k_params, vocab=VOCAB, max_pos=16, bert_hidden=32,
                         num_layers=2, intermediate=64,
                         metadata_dim=METADATA_DIM, hidden_dim=32,
                         num_preds=NUM_PREDS)

    kf_input = jax.random.randint(k_ids, (B, S), 0, VOCAB, dtype=jnp.int32)
    kf_mask = jnp.ones((B, S), dtype=jnp.int32)
    metadata = jax.random.normal(k_meta, (B, METADATA_DIM), jnp.float32)

    # num_heads / num_preds are static Python ints (NOT in the params pytree),
    # so reshapes inside the trace see concrete values.
    fwd = jax.jit(functools.partial(multitask_bert_forward,
                                    num_heads=NUM_HEADS, num_preds=NUM_PREDS))
    out = fwd(params, kf_input, kf_mask, metadata)
    out = jax.block_until_ready(out)

    assert out.shape == (B, NUM_PREDS, 3), out.shape
    assert bool(jnp.all(jnp.isfinite(out)))
    # softmax channel should sum to 1 per example
    assert bool(jnp.allclose(jnp.sum(out[..., 2], axis=1), 1.0, atol=1e-5))

    print("KERNEL_OK")
</pallas_src>

<mosaic_0001>
module attributes {stable_mosaic.version = 11 : i64} {
  func.func @_model_kernel(%arg0: i32, %arg1: i32, %arg2: memref<1x8x32xf32, #tpu.memory_space<vmem>>, %arg3: memref<8x32xf32, #tpu.memory_space<vmem>>, %arg4: memref<1x32xf32, #tpu.memory_space<vmem>>, %arg5: memref<1x1x8xi32, #tpu.memory_space<vmem>>, %arg6: memref<1x32xf32, #tpu.memory_space<vmem>>, %arg7: memref<1x32xf32, #tpu.memory_space<vmem>>, %arg8: memref<1x32x96xf32, #tpu.memory_space<vmem>>, %arg9: memref<1x1x96xf32, #tpu.memory_space<vmem>>, %arg10: memref<1x32x32xf32, #tpu.memory_space<vmem>>, %arg11: memref<1x1x32xf32, #tpu.memory_space<vmem>>, %arg12: memref<1x1x32xf32, #tpu.memory_space<vmem>>, %arg13: memref<1x1x32xf32, #tpu.memory_space<vmem>>, %arg14: memref<1x32x64xf32, #tpu.memory_space<vmem>>, %arg15: memref<1x1x64xf32, #tpu.memory_space<vmem>>, %arg16: memref<1x64x32xf32, #tpu.memory_space<vmem>>, %arg17: memref<1x1x32xf32, #tpu.memory_space<vmem>>, %arg18: memref<1x1x32xf32, #tpu.memory_space<vmem>>, %arg19: memref<1x1x32xf32, #tpu.memory_space<vmem>>, %arg20: memref<1x1x6xf32, #tpu.memory_space<vmem>>, %arg21: memref<32x32xf32, #tpu.memory_space<vmem>>, %arg22: memref<1x32xf32, #tpu.memory_space<vmem>>, %arg23: memref<6x32xf32, #tpu.memory_space<vmem>>, %arg24: memref<1x32xf32, #tpu.memory_space<vmem>>, %arg25: memref<32x32xf32, #tpu.memory_space<vmem>>, %arg26: memref<1x32xf32, #tpu.memory_space<vmem>>, %arg27: memref<32x32xf32, #tpu.memory_space<vmem>>, %arg28: memref<32x32xf32, #tpu.memory_space<vmem>>, %arg29: memref<1x32xf32, #tpu.memory_space<vmem>>, %arg30: memref<32x32xf32, #tpu.memory_space<vmem>>, %arg31: memref<1x32xf32, #tpu.memory_space<vmem>>, %arg32: memref<32x10xf32, #tpu.memory_space<vmem>>, %arg33: memref<1x10xf32, #tpu.memory_space<vmem>>, %arg34: memref<32x5xf32, #tpu.memory_space<vmem>>, %arg35: memref<1x5xf32, #tpu.memory_space<vmem>>, %arg36: memref<1x1x15xf32, #tpu.memory_space<vmem>>, %arg37: memref<8x32xf32, #tpu.memory_space<vmem>>) attributes {dimension_semantics = [#tpu.dimension_semantics<parallel>, #tpu.dimension_semantics<arbitrary>], iteration_bounds = array<i64: 2, 2>, scalar_prefetch = 0 : i64, scratch_operands = 1 : i64, tpu.core_type = #tpu.core_type<tc>, window_params = [{transform_indices = @transform_0, window_bounds = array<i64: 1, 8, 32>}, {pipeline_mode = #tpu.pipeline_mode<synchronous>, transform_indices = @transform_1, window_bounds = array<i64: 8, 32>}, {pipeline_mode = #tpu.pipeline_mode<synchronous>, transform_indices = @transform_2, window_bounds = array<i64: 1, 32>}, {transform_indices = @transform_3, window_bounds = array<i64: 1, 1, 8>}, {pipeline_mode = #tpu.pipeline_mode<synchronous>, transform_indices = @transform_4, window_bounds = array<i64: 1, 32>}, {pipeline_mode = #tpu.pipeline_mode<synchronous>, transform_indices = @transform_5, window_bounds = array<i64: 1, 32>}, {transform_indices = @transform_6, window_bounds = array<i64: 1, 32, 96>}, {transform_indices = @transform_7, window_bounds = array<i64: 1, 1, 96>}, {transform_indices = @transform_8, window_bounds = array<i64: 1, 32, 32>}, {transform_indices = @transform_9, window_bounds = array<i64: 1, 1, 32>}, {transform_indices = @transform_10, window_bounds = array<i64: 1, 1, 32>}, {transform_indices = @transform_11, window_bounds = array<i64: 1, 1, 32>}, {transform_indices = @transform_12, window_bounds = array<i64: 1, 32, 64>}, {transform_indices = @transform_13, window_bounds = array<i64: 1, 1, 64>}, {transform_indices = @transform_14, window_bounds = array<i64: 1, 64, 32>}, {transform_indices = @transform_15, window_bounds = array<i64: 1, 1, 32>}, {transform_indices = @transform_16, window_bounds = array<i64: 1, 1, 32>}, {transform_indices = @transform_17, window_bounds = array<i64: 1, 1, 32>}, {transform_indices = @transform_18, window_bounds = array<i64: 1, 1, 6>}, {pipeline_mode = #tpu.pipeline_mode<synchronous>, transform_indices = @transform_19, window_bounds = array<i64: 32, 32>}, {pipeline_mode = #tpu.pipeline_mode<synchronous>, transform_indices = @transform_20, window_bounds = array<i64: 1, 32>}, {pipeline_mode = #tpu.pipeline_mode<synchronous>, transform_indices = @transform_21, window_bounds = array<i64: 6, 32>}, {pipeline_mode = #tpu.pipeline_mode<synchronous>, transform_indices = @transform_22, window_bounds = array<i64: 1, 32>}, {pipeline_mode = #tpu.pipeline_mode<synchronous>, transform_indices = @transform_23, window_bounds = array<i64: 32, 32>}, {pipeline_mode = #tpu.pipeline_mode<synchronous>, transform_indices = @transform_24, window_bounds = array<i64: 1, 32>}, {pipeline_mode = #tpu.pipeline_mode<synchronous>, transform_indices = @transform_25, window_bounds = array<i64: 32, 32>}, {pipeline_mode = #tpu.pipeline_mode<synchronous>, transform_indices = @transform_26, window_bounds = array<i64: 32, 32>}, {pipeline_mode = #tpu.pipeline_mode<synchronous>, transform_indices = @transform_27, window_bounds = array<i64: 1, 32>}, {pipeline_mode = #tpu.pipeline_mode<synchronous>, transform_indices = @transform_28, window_bounds = array<i64: 32, 32>}, {pipeline_mode = #tpu.pipeline_mode<synchronous>, transform_indices = @transform_29, window_bounds = array<i64: 1, 32>}, {pipeline_mode = #tpu.pipeline_mode<synchronous>, transform_indices = @transform_30, window_bounds = array<i64: 32, 10>}, {pipeline_mode = #tpu.pipeline_mode<synchronous>, transform_indices = @transform_31, window_bounds = array<i64: 1, 10>}, {pipeline_mode = #tpu.pipeline_mode<synchronous>, transform_indices = @transform_32, window_bounds = array<i64: 32, 5>}, {pipeline_mode = #tpu.pipeline_mode<synchronous>, transform_indices = @transform_33, window_bounds = array<i64: 1, 5>}, {transform_indices = @transform_34, window_bounds = array<i64: 1, 1, 15>}]} {
    %c0_i32 = arith.constant 0 : i32
    %0 = arith.cmpi eq, %arg1, %c0_i32 : i32
    %1 = arith.extui %0 : i1 to i32
    %c0_i32_0 = arith.constant 0 : i32
    %2 = arith.cmpi ne, %1, %c0_i32_0 : i32
    scf.if %2 {
      %c0_74 = arith.constant 0 : index
      %c0_75 = arith.constant 0 : index
      %c0_76 = arith.constant 0 : index
      %150 = vector.load %arg2[%c0_74, %c0_75, %c0_76] : memref<1x8x32xf32, #tpu.memory_space<vmem>>, vector<1x8x32xf32>
      %151 = vector.shape_cast %150 : vector<1x8x32xf32> to vector<8x32xf32>
      %c0_77 = arith.constant 0 : index
      %c0_78 = arith.constant 0 : index
      %152 = vector.load %arg3[%c0_77, %c0_78] : memref<8x32xf32, #tpu.memory_space<vmem>>, vector<8x32xf32>
      %153 = arith.addf %151, %152 : vector<8x32xf32>
      %c0_79 = arith.constant 0 : index
      %c0_80 = arith.constant 0 : index
      %154 = vector.load %arg4[%c0_79, %c0_80] : memref<1x32xf32, #tpu.memory_space<vmem>>, vector<1x32xf32>
      %155 = vector.broadcast %154 : vector<1x32xf32> to vector<8x32xf32>
      %156 = arith.addf %153, %155 : vector<8x32xf32>
      %c0_81 = arith.constant 0 : index
      %c0_82 = arith.constant 0 : index
      %157 = vector.load %arg6[%c0_81, %c0_82] : memref<1x32xf32, #tpu.memory_space<vmem>>, vector<1x32xf32>
      %c0_83 = arith.constant 0 : index
      %c0_84 = arith.constant 0 : index
      %158 = vector.load %arg7[%c0_83, %c0_84] : memref<1x32xf32, #tpu.memory_space<vmem>>, vector<1x32xf32>
      %cst_85 = arith.constant dense<0.000000e+00> : vector<8xf32>
      %159 = vector.multi_reduction <add>, %156, %cst_85 [1] : vector<8x32xf32> to vector<8xf32>
      %160 = vector.shape_cast %159 : vector<8xf32> to vector<8x1xf32>
      %cst_86 = arith.constant 3.200000e+01 : f32
      %161 = vector.broadcast %cst_86 : f32 to vector<8x1xf32>
      %162 = arith.divf %160, %161 : vector<8x1xf32>
      %163 = vector.broadcast %162 : vector<8x1xf32> to vector<8x32xf32>
      %164 = arith.subf %156, %163 : vector<8x32xf32>
      %165 = arith.mulf %164, %164 : vector<8x32xf32>
      %cst_87 = arith.constant dense<0.000000e+00> : vector<8xf32>
      %166 = vector.multi_reduction <add>, %165, %cst_87 [1] : vector<8x32xf32> to vector<8xf32>
      %167 = vector.shape_cast %166 : vector<8xf32> to vector<8x1xf32>
      %cst_88 = arith.constant 3.200000e+01 : f32
      %168 = vector.broadcast %cst_88 : f32 to vector<8x1xf32>
      %169 = arith.divf %167, %168 : vector<8x1xf32>
      %170 = vector.broadcast %162 : vector<8x1xf32> to vector<8x32xf32>
      %171 = arith.subf %156, %170 : vector<8x32xf32>
      %cst_89 = arith.constant 9.99999996E-13 : f32
      %172 = vector.broadcast %cst_89 : f32 to vector<8x1xf32>
      %173 = arith.addf %169, %172 : vector<8x1xf32>
      %174 = math.rsqrt %173 : vector<8x1xf32>
      %175 = vector.broadcast %174 : vector<8x1xf32> to vector<8x32xf32>
      %176 = arith.mulf %171, %175 : vector<8x32xf32>
      %177 = vector.broadcast %157 : vector<1x32xf32> to vector<8x32xf32>
      %178 = arith.mulf %176, %177 : vector<8x32xf32>
      %179 = vector.broadcast %158 : vector<1x32xf32> to vector<8x32xf32>
      %180 = arith.addf %178, %179 : vector<8x32xf32>
      %c0_90 = arith.constant 0 : index
      %c0_91 = arith.constant 0 : index
      %181 = vector.load %arg37[%c0_90, %c0_91] : memref<8x32xf32, #tpu.memory_space<vmem>>, vector<8x32xf32>
      tpu.vector_store %arg37[%c0_90, %c0_91], %180 {strides = array<i32>} : memref<8x32xf32, #tpu.memory_space<vmem>>, vector<8x32xf32>,
    } else {
    }
    %c0 = arith.constant 0 : index
    %c0_1 = arith.constant 0 : index
    %3 = vector.load %arg37[%c0, %c0_1] : memref<8x32xf32, #tpu.memory_space<vmem>>, vector<8x32xf32>
    %c0_2 = arith.constant 0 : index
    %c0_3 = arith.constant 0 : index
    %c0_4 = arith.constant 0 : index
    %4 = vector.load %arg5[%c0_2, %c0_3, %c0_4] : memref<1x1x8xi32, #tpu.memory_space<vmem>>, vector<1x1x8xi32>
    %5 = vector.shape_cast %4 : vector<1x1x8xi32> to vector<1x8xi32>
    %6 = arith.sitofp %5 : vector<1x8xi32> to vector<1x8xf32>
    %cst = arith.constant 1.000000e+00 : f32
    %7 = vector.broadcast %cst : f32 to vector<1x8xf32>
    %8 = arith.subf %7, %6 : vector<1x8xf32>
    %cst_5 = arith.constant -1.000000e+09 : f32
    %9 = vector.broadcast %cst_5 : f32 to vector<1x8xf32>
    %10 = arith.mulf %8, %9 : vector<1x8xf32>
    %c0_6 = arith.constant 0 : index
    %c0_7 = arith.constant 0 : index
    %c0_8 = arith.constant 0 : index
    %11 = vector.load %arg8[%c0_6, %c0_7, %c0_8] : memref<1x32x96xf32, #tpu.memory_space<vmem>>, vector<1x32x96xf32>
    %12 = vector.shape_cast %11 : vector<1x32x96xf32> to vector<32x96xf32>
    %cst_9 = arith.constant dense<0.000000e+00> : vector<8x96xf32>
    %13 = tpu.matmul %3, %12, %cst_9 {dimension_numbers = #tpu.dot_dimension_numbers<[1], [0], [0], [1], [0, 0, 1, 1], [], []>} : vector<8x32xf32>, vector<32x96xf32>, vector<8x96xf32> -> vector<8x96xf32>
    %c0_10 = arith.constant 0 : index
    %c0_11 = arith.constant 0 : index
    %c0_12 = arith.constant 0 : index
    %14 = vector.load %arg9[%c0_10, %c0_11, %c0_12] : memref<1x1x96xf32, #tpu.memory_space<vmem>>, vector<1x1x96xf32>
    %15 = vector.shape_cast %14 : vector<1x1x96xf32> to vector<1x96xf32>
    %16 = vector.broadcast %15 : vector<1x96xf32> to vector<8x96xf32>
    %17 = arith.addf %13, %16 : vector<8x96xf32>
    %c0_13 = arith.constant 0 : index
    %c0_14 = arith.constant 0 : index
    %c0_15 = arith.constant 0 : index
    %18 = vector.load %arg10[%c0_13, %c0_14, %c0_15] : memref<1x32x32xf32, #tpu.memory_space<vmem>>, vector<1x32x32xf32>
    %19 = vector.shape_cast %18 : vector<1x32x32xf32> to vector<32x32xf32>
    %20 = vector.extract_strided_slice %17 {offsets = [0, 0], sizes = [8, 16], strides = [1, 1]} : vector<8x96xf32> to vector<8x16xf32>
    %21 = vector.extract_strided_slice %17 {offsets = [0, 32], sizes = [8, 16], strides = [1, 1]} : vector<8x96xf32> to vector<8x16xf32>
    %22 = vector.extract_strided_slice %17 {offsets = [0, 64], sizes = [8, 16], strides = [1, 1]} : vector<8x96xf32> to vector<8x16xf32>
    %cst_16 = arith.constant dense<0.000000e+00> : vector<8x8xf32>
    %23 = tpu.matmul %20, %21, %cst_16 {dimension_numbers = #tpu.dot_dimension_numbers<[1], [1], [0], [0], [0, 0, 1, 0], [], []>} : vector<8x16xf32>, vector<8x16xf32>, vector<8x8xf32> -> vector<8x8xf32>
    %cst_17 = arith.constant 2.500000e-01 : f32
    %24 = vector.broadcast %cst_17 : f32 to vector<8x8xf32>
    %25 = arith.mulf %23, %24 : vector<8x8xf32>
    %26 = vector.broadcast %10 : vector<1x8xf32> to vector<8x8xf32>
    %27 = arith.addf %25, %26 : vector<8x8xf32>
    %cst_18 = arith.constant dense<0xFF800000> : vector<8xf32>
    %28 = vector.multi_reduction <maximumf>, %27, %cst_18 [1] : vector<8x8xf32> to vector<8xf32>
    %29 = vector.shape_cast %28 : vector<8xf32> to vector<8x1xf32>
    %30 = vector.broadcast %29 : vector<8x1xf32> to vector<8x8xf32>
    %31 = arith.subf %27, %30 : vector<8x8xf32>
    %32 = math.exp %31 : vector<8x8xf32>
    %cst_19 = arith.constant dense<0.000000e+00> : vector<8xf32>
    %33 = vector.multi_reduction <add>, %32, %cst_19 [1] : vector<8x8xf32> to vector<8xf32>
    %34 = vector.shape_cast %33 : vector<8xf32> to vector<8x1xf32>
    %35 = vector.broadcast %34 : vector<8x1xf32> to vector<8x8xf32>
    %36 = arith.divf %32, %35 : vector<8x8xf32>
    %cst_20 = arith.constant dense<0.000000e+00> : vector<8x16xf32>
    %37 = tpu.matmul %36, %22, %cst_20 {dimension_numbers = #tpu.dot_dimension_numbers<[1], [0], [0], [1], [0, 0, 1, 1], [], []>} : vector<8x8xf32>, vector<8x16xf32>, vector<8x16xf32> -> vector<8x16xf32>
    %38 = vector.extract_strided_slice %19 {offsets = [0, 0], sizes = [16, 32], strides = [1, 1]} : vector<32x32xf32> to vector<16x32xf32>
    %cst_21 = arith.constant dense<0.000000e+00> : vector<8x32xf32>
    %39 = tpu.matmul %37, %38, %cst_21 {dimension_numbers = #tpu.dot_dimension_numbers<[1], [0], [0], [1], [0, 0, 1, 1], [], []>} : vector<8x16xf32>, vector<16x32xf32>, vector<8x32xf32> -> vector<8x32xf32>
    %40 = vector.extract_strided_slice %17 {offsets = [0, 16], sizes = [8, 16], strides = [1, 1]} : vector<8x96xf32> to vector<8x16xf32>
    %41 = vector.extract_strided_slice %17 {offsets = [0, 48], sizes = [8, 16], strides = [1, 1]} : vector<8x96xf32> to vector<8x16xf32>
    %42 = vector.extract_strided_slice %17 {offsets = [0, 80], sizes = [8, 16], strides = [1, 1]} : vector<8x96xf32> to vector<8x16xf32>
    %cst_22 = arith.constant dense<0.000000e+00> : vector<8x8xf32>
    %43 = tpu.matmul %40, %41, %cst_22 {dimension_numbers = #tpu.dot_dimension_numbers<[1], [1], [0], [0], [0, 0, 1, 0], [], []>} : vector<8x16xf32>, vector<8x16xf32>, vector<8x8xf32> -> vector<8x8xf32>
    %cst_23 = arith.constant 2.500000e-01 : f32
    %44 = vector.broadcast %cst_23 : f32 to vector<8x8xf32>
    %45 = arith.mulf %43, %44 : vector<8x8xf32>
    %46 = vector.broadcast %10 : vector<1x8xf32> to vector<8x8xf32>
    %47 = arith.addf %45, %46 : vector<8x8xf32>
    %cst_24 = arith.constant dense<0xFF800000> : vector<8xf32>
    %48 = vector.multi_reduction <maximumf>, %47, %cst_24 [1] : vector<8x8xf32> to vector<8xf32>
    %49 = vector.shape_cast %48 : vector<8xf32> to vector<8x1xf32>
    %50 = vector.broadcast %49 : vector<8x1xf32> to vector<8x8xf32>
    %51 = arith.subf %47, %50 : vector<8x8xf32>
    %52 = math.exp %51 : vector<8x8xf32>
    %cst_25 = arith.constant dense<0.000000e+00> : vector<8xf32>
    %53 = vector.multi_reduction <add>, %52, %cst_25 [1] : vector<8x8xf32> to vector<8xf32>
    %54 = vector.shape_cast %53 : vector<8xf32> to vector<8x1xf32>
    %55 = vector.broadcast %54 : vector<8x1xf32> to vector<8x8xf32>
    %56 = arith.divf %52, %55 : vector<8x8xf32>
    %cst_26 = arith.constant dense<0.000000e+00> : vector<8x16xf32>
    %57 = tpu.matmul %56, %42, %cst_26 {dimension_numbers = #tpu.dot_dimension_numbers<[1], [0], [0], [1], [0, 0, 1, 1], [], []>} : vector<8x8xf32>, vector<8x16xf32>, vector<8x16xf32> -> vector<8x16xf32>
    %58 = vector.extract_strided_slice %19 {offsets = [16, 0], sizes = [16, 32], strides = [1, 1]} : vector<32x32xf32> to vector<16x32xf32>
    %cst_27 = arith.constant dense<0.000000e+00> : vector<8x32xf32>
    %59 = tpu.matmul %57, %58, %cst_27 {dimension_numbers = #tpu.dot_dimension_numbers<[1], [0], [0], [1], [0, 0, 1, 1], [], []>} : vector<8x16xf32>, vector<16x32xf32>, vector<8x32xf32> -> vector<8x32xf32>
    %60 = arith.addf %39, %59 : vector<8x32xf32>
    %c0_28 = arith.constant 0 : index
    %c0_29 = arith.constant 0 : index
    %c0_30 = arith.constant 0 : index
    %61 = vector.load %arg11[%c0_28, %c0_29, %c0_30] : memref<1x1x32xf32, #tpu.memory_space<vmem>>, vector<1x1x32xf32>
    %62 = vector.shape_cast %61 : vector<1x1x32xf32> to vector<1x32xf32>
    %63 = vector.broadcast %62 : vector<1x32xf32> to vector<8x32xf32>
    %64 = arith.addf %60, %63 : vector<8x32xf32>
    %65 = arith.addf %64, %3 : vector<8x32xf32>
    %c0_31 = arith.constant 0 : index
    %c0_32 = arith.constant 0 : index
    %c0_33 = arith.constant 0 : index
    %66 = vector.load %arg12[%c0_31, %c0_32, %c0_33] : memref<1x1x32xf32, #tpu.memory_space<vmem>>, vector<1x1x32xf32>
    %67 = vector.shape_cast %66 : vector<1x1x32xf32> to vector<1x32xf32>
    %c0_34 = arith.constant 0 : index
    %c0_35 = arith.constant 0 : index
    %c0_36 = arith.constant 0 : index
    %68 = vector.load %arg13[%c0_34, %c0_35, %c0_36] : memref<1x1x32xf32, #tpu.memory_space<vmem>>, vector<1x1x32xf32>
    %69 = vector.shape_cast %68 : vector<1x1x32xf32> to vector<1x32xf32>
    %cst_37 = arith.constant dense<0.000000e+00> : vector<8xf32>
    %70 = vector.multi_reduction <add>, %65, %cst_37 [1] : vector<8x32xf32> to vector<8xf32>
    %71 = vector.shape_cast %70 : vector<8xf32> to vector<8x1xf32>
    %cst_38 = arith.constant 3.200000e+01 : f32
    %72 = vector.broadcast %cst_38 : f32 to vector<8x1xf32>
    %73 = arith.divf %71, %72 : vector<8x1xf32>
    %74 = vector.broadcast %73 : vector<8x1xf32> to vector<8x32xf32>
    %75 = arith.subf %65, %74 : vector<8x32xf32>
    %76 = arith.mulf %75, %75 : vector<8x32xf32>
    %cst_39 = arith.constant dense<0.000000e+00> : vector<8xf32>
    %77 = vector.multi_reduction <add>, %76, %cst_39 [1] : vector<8x32xf32> to vector<8xf32>
    %78 = vector.shape_cast %77 : vector<8xf32> to vector<8x1xf32>
    %cst_40 = arith.constant 3.200000e+01 : f32
    %79 = vector.broadcast %cst_40 : f32 to vector<8x1xf32>
    %80 = arith.divf %78, %79 : vector<8x1xf32>
    %81 = vector.broadcast %73 : vector<8x1xf32> to vector<8x32xf32>
    %82 = arith.subf %65, %81 : vector<8x32xf32>
    %cst_41 = arith.constant 9.99999996E-13 : f32
    %83 = vector.broadcast %cst_41 : f32 to vector<8x1xf32>
    %84 = arith.addf %80, %83 : vector<8x1xf32>
    %85 = math.rsqrt %84 : vector<8x1xf32>
    %86 = vector.broadcast %85 : vector<8x1xf32> to vector<8x32xf32>
    %87 = arith.mulf %82, %86 : vector<8x32xf32>
    %88 = vector.broadcast %67 : vector<1x32xf32> to vector<8x32xf32>
    %89 = arith.mulf %87, %88 : vector<8x32xf32>
    %90 = vector.broadcast %69 : vector<1x32xf32> to vector<8x32xf32>
    %91 = arith.addf %89, %90 : vector<8x32xf32>
    %c0_42 = arith.constant 0 : index
    %c0_43 = arith.constant 0 : index
    %c0_44 = arith.constant 0 : index
    %92 = vector.load %arg14[%c0_42, %c0_43, %c0_44] : memref<1x32x64xf32, #tpu.memory_space<vmem>>, vector<1x32x64xf32>
    %93 = vector.shape_cast %92 : vector<1x32x64xf32> to vector<32x64xf32>
    %cst_45 = arith.constant dense<0.000000e+00> : vector<8x64xf32>
    %94 = tpu.matmul %91, %93, %cst_45 {dimension_numbers = #tpu.dot_dimension_numbers<[1], [0], [0], [1], [0, 0, 1, 1], [], []>} : vector<8x32xf32>, vector<32x64xf32>, vector<8x64xf32> -> vector<8x64xf32>
    %c0_46 = arith.constant 0 : index
    %c0_47 = arith.constant 0 : index
    %c0_48 = arith.constant 0 : index
    %95 = vector.load %arg15[%c0_46, %c0_47, %c0_48] : memref<1x1x64xf32, #tpu.memory_space<vmem>>, vector<1x1x64xf32>
    %96 = vector.shape_cast %95 : vector<1x1x64xf32> to vector<1x64xf32>
    %97 = vector.broadcast %96 : vector<1x64xf32> to vector<8x64xf32>
    %98 = arith.addf %94, %97 : vector<8x64xf32>
    %cst_49 = arith.constant 5.000000e-01 : f32
    %99 = vector.broadcast %cst_49 : f32 to vector<8x64xf32>
    %100 = arith.mulf %99, %98 : vector<8x64xf32>
    %cst_50 = arith.constant 4.471500e-02 : f32
    %101 = vector.broadcast %cst_50 : f32 to vector<8x64xf32>
    %102 = arith.mulf %101, %98 : vector<8x64xf32>
    %103 = arith.mulf %102, %98 : vector<8x64xf32>
    %104 = arith.mulf %103, %98 : vector<8x64xf32>
    %105 = arith.addf %98, %104 : vector<8x64xf32>
    %cst_51 = arith.constant 0.797884583 : f32
    %106 = vector.broadcast %cst_51 : f32 to vector<8x64xf32>
    %107 = arith.mulf %106, %105 : vector<8x64xf32>
    %108 = math.tanh %107 : vector<8x64xf32>
    %cst_52 = arith.constant 1.000000e+00 : f32
    %109 = vector.broadcast %cst_52 : f32 to vector<8x64xf32>
    %110 = arith.addf %109, %108 : vector<8x64xf32>
    %111 = arith.mulf %100, %110 : vector<8x64xf32>
    %c0_53 = arith.constant 0 : index
    %c0_54 = arith.constant 0 : index
    %c0_55 = arith.constant 0 : index
    %112 = vector.load %arg16[%c0_53, %c0_54, %c0_55] : memref<1x64x32xf32, #tpu.memory_space<vmem>>, vector<1x64x32xf32>
    %113 = vector.shape_cast %112 : vector<1x64x32xf32> to vector<64x32xf32>
    %cst_56 = arith.constant dense<0.000000e+00> : vector<8x32xf32>
    %114 = tpu.matmul %111, %113, %cst_56 {dimension_numbers = #tpu.dot_dimension_numbers<[1], [0], [0], [1], [0, 0, 1, 1], [], []>} : vector<8x64xf32>, vector<64x32xf32>, vector<8x32xf32> -> vector<8x32xf32>
    %c0_57 = arith.constant 0 : index
    %c0_58 = arith.constant 0 : index
    %c0_59 = arith.constant 0 : index
    %115 = vector.load %arg17[%c0_57, %c0_58, %c0_59] : memref<1x1x32xf32, #tpu.memory_space<vmem>>, vector<1x1x32xf32>
    %116 = vector.shape_cast %115 : vector<1x1x32xf32> to vector<1x32xf32>
    %117 = vector.broadcast %116 : vector<1x32xf32> to vector<8x32xf32>
    %118 = arith.addf %114, %117 : vector<8x32xf32>
    %119 = arith.addf %118, %91 : vector<8x32xf32>
    %c0_60 = arith.constant 0 : index
    %c0_61 = arith.constant 0 : index
    %c0_62 = arith.constant 0 : index
    %120 = vector.load %arg18[%c0_60, %c0_61, %c0_62] : memref<1x1x32xf32, #tpu.memory_space<vmem>>, vector<1x1x32xf32>
    %121 = vector.shape_cast %120 : vector<1x1x32xf32> to vector<1x32xf32>
    %c0_63 = arith.constant 0 : index
    %c0_64 = arith.constant 0 : index
    %c0_65 = arith.constant 0 : index
    %122 = vector.load %arg19[%c0_63, %c0_64, %c0_65] : memref<1x1x32xf32, #tpu.memory_space<vmem>>, vector<1x1x32xf32>
    %123 = vector.shape_cast %122 : vector<1x1x32xf32> to vector<1x32xf32>
    %cst_66 = arith.constant dense<0.000000e+00> : vector<8xf32>
    %124 = vector.multi_reduction <add>, %119, %cst_66 [1] : vector<8x32xf32> to vector<8xf32>
    %125 = vector.shape_cast %124 : vector<8xf32> to vector<8x1xf32>
    %cst_67 = arith.constant 3.200000e+01 : f32
    %126 = vector.broadcast %cst_67 : f32 to vector<8x1xf32>
    %127 = arith.divf %125, %126 : vector<8x1xf32>
    %128 = vector.broadcast %127 : vector<8x1xf32> to vector<8x32xf32>
    %129 = arith.subf %119, %128 : vector<8x32xf32>
    %130 = arith.mulf %129, %129 : vector<8x32xf32>
    %cst_68 = arith.constant dense<0.000000e+00> : vector<8xf32>
    %131 = vector.multi_reduction <add>, %130, %cst_68 [1] : vector<8x32xf32> to vector<8xf32>
    %132 = vector.shape_cast %131 : vector<8xf32> to vector<8x1xf32>
    %cst_69 = arith.constant 3.200000e+01 : f32
    %133 = vector.broadcast %cst_69 : f32 to vector<8x1xf32>
    %134 = arith.divf %132, %133 : vector<8x1xf32>
    %135 = vector.broadcast %127 : vector<8x1xf32> to vector<8x32xf32>
    %136 = arith.subf %119, %135 : vector<8x32xf32>
    %cst_70 = arith.constant 9.99999996E-13 : f32
    %137 = vector.broadcast %cst_70 : f32 to vector<8x1xf32>
    %138 = arith.addf %134, %137 : vector<8x1xf32>
    %139 = math.rsqrt %138 : vector<8x1xf32>
    %140 = vector.broadcast %139 : vector<8x1xf32> to vector<8x32xf32>
    %141 = arith.mulf %136, %140 : vector<8x32xf32>
    %142 = vector.broadcast %121 : vector<1x32xf32> to vector<8x32xf32>
    %143 = arith.mulf %141, %142 : vector<8x32xf32>
    %144 = vector.broadcast %123 : vector<1x32xf32> to vector<8x32xf32>
    %145 = arith.addf %143, %144 : vector<8x32xf32>
    %c0_71 = arith.constant 0 : index
    %c0_72 = arith.constant 0 : index
    %146 = vector.load %arg37[%c0_71, %c0_72] : memref<8x32xf32, #tpu.memory_space<vmem>>, vector<8x32xf32>
    tpu.vector_store %arg37[%c0_71, %c0_72], %145 {strides = array<i32>} : memref<8x32xf32, #tpu.memory_space<vmem>>, vector<8x32xf32>,
    %c1_i32 = arith.constant 1 : i32
    %147 = arith.cmpi eq, %arg1, %c1_i32 : i32
    %148 = arith.extui %147 : i1 to i32
    %c0_i32_73 = arith.constant 0 : i32
    %149 = arith.cmpi ne, %148, %c0_i32_73 : i32
    scf.if %149 {
      %150 = vector.extract_strided_slice %145 {offsets = [0, 0], sizes = [1, 32], strides = [1, 1]} : vector<8x32xf32> to vector<1x32xf32>
      %c0_74 = arith.constant 0 : index
      %c0_75 = arith.constant 0 : index
      %151 = vector.load %arg21[%c0_74, %c0_75] : memref<32x32xf32, #tpu.memory_space<vmem>>, vector<32x32xf32>
      %cst_76 = arith.constant dense<0.000000e+00> : vector<1x32xf32>
      %152 = tpu.matmul %150, %151, %cst_76 {dimension_numbers = #tpu.dot_dimension_numbers<[1], [0], [0], [1], [0, 0, 1, 1], [], []>} : vector<1x32xf32>, vector<32x32xf32>, vector<1x32xf32> -> vector<1x32xf32>
      %c0_77 = arith.constant 0 : index
      %c0_78 = arith.constant 0 : index
      %153 = vector.load %arg22[%c0_77, %c0_78] : memref<1x32xf32, #tpu.memory_space<vmem>>, vector<1x32xf32>
      %154 = arith.addf %152, %153 : vector<1x32xf32>
      %155 = math.tanh %154 : vector<1x32xf32>
      %c0_79 = arith.constant 0 : index
      %c0_80 = arith.constant 0 : index
      %c0_81 = arith.constant 0 : index
      %156 = vector.load %arg20[%c0_79, %c0_80, %c0_81] : memref<1x1x6xf32, #tpu.memory_space<vmem>>, vector<1x1x6xf32>
      %157 = vector.shape_cast %156 : vector<1x1x6xf32> to vector<1x6xf32>
      %c0_82 = arith.constant 0 : index
      %c0_83 = arith.constant 0 : index
      %158 = vector.load %arg23[%c0_82, %c0_83] : memref<6x32xf32, #tpu.memory_space<vmem>>, vector<6x32xf32>
      %cst_84 = arith.constant dense<0.000000e+00> : vector<1x32xf32>
      %159 = tpu.matmul %157, %158, %cst_84 {dimension_numbers = #tpu.dot_dimension_numbers<[1], [0], [0], [1], [0, 0, 1, 1], [], []>} : vector<1x6xf32>, vector<6x32xf32>, vector<1x32xf32> -> vector<1x32xf32>
      %c0_85 = arith.constant 0 : index
      %c0_86 = arith.constant 0 : index
      %160 = vector.load %arg24[%c0_85, %c0_86] : memref<1x32xf32, #tpu.memory_space<vmem>>, vector<1x32xf32>
      %161 = arith.addf %159, %160 : vector<1x32xf32>
      %cst_87 = arith.constant 0.000000e+00 : f32
      %162 = vector.broadcast %cst_87 : f32 to vector<1x32xf32>
      %163 = arith.maximumf %161, %162 : vector<1x32xf32>
      %c0_88 = arith.constant 0 : index
      %c0_89 = arith.constant 0 : index
      %164 = vector.load %arg25[%c0_88, %c0_89] : memref<32x32xf32, #tpu.memory_space<vmem>>, vector<32x32xf32>
      %cst_90 = arith.constant dense<0.000000e+00> : vector<1x32xf32>
      %165 = tpu.matmul %163, %164, %cst_90 {dimension_numbers = #tpu.dot_dimension_numbers<[1], [0], [0], [1], [0, 0, 1, 1], [], []>} : vector<1x32xf32>, vector<32x32xf32>, vector<1x32xf32> -> vector<1x32xf32>
      %c0_91 = arith.constant 0 : index
      %c0_92 = arith.constant 0 : index
      %166 = vector.load %arg26[%c0_91, %c0_92] : memref<1x32xf32, #tpu.memory_space<vmem>>, vector<1x32xf32>
      %167 = arith.addf %165, %166 : vector<1x32xf32>
      %c0_93 = arith.constant 0 : index
      %c0_94 = arith.constant 0 : index
      %168 = vector.load %arg27[%c0_93, %c0_94] : memref<32x32xf32, #tpu.memory_space<vmem>>, vector<32x32xf32>
      %cst_95 = arith.constant dense<0.000000e+00> : vector<1x32xf32>
      %169 = tpu.matmul %155, %168, %cst_95 {dimension_numbers = #tpu.dot_dimension_numbers<[1], [0], [0], [1], [0, 0, 1, 1], [], []>} : vector<1x32xf32>, vector<32x32xf32>, vector<1x32xf32> -> vector<1x32xf32>
      %c0_96 = arith.constant 0 : index
      %c0_97 = arith.constant 0 : index
      %170 = vector.load %arg28[%c0_96, %c0_97] : memref<32x32xf32, #tpu.memory_space<vmem>>, vector<32x32xf32>
      %cst_98 = arith.constant dense<0.000000e+00> : vector<1x32xf32>
      %171 = tpu.matmul %167, %170, %cst_98 {dimension_numbers = #tpu.dot_dimension_numbers<[1], [0], [0], [1], [0, 0, 1, 1], [], []>} : vector<1x32xf32>, vector<32x32xf32>, vector<1x32xf32> -> vector<1x32xf32>
      %172 = arith.addf %169, %171 : vector<1x32xf32>
      %c0_99 = arith.constant 0 : index
      %c0_100 = arith.constant 0 : index
      %173 = vector.load %arg29[%c0_99, %c0_100] : memref<1x32xf32, #tpu.memory_space<vmem>>, vector<1x32xf32>
      %174 = arith.addf %172, %173 : vector<1x32xf32>
      %c0_101 = arith.constant 0 : index
      %c0_102 = arith.constant 0 : index
      %175 = vector.load %arg30[%c0_101, %c0_102] : memref<32x32xf32, #tpu.memory_space<vmem>>, vector<32x32xf32>
      %cst_103 = arith.constant dense<0.000000e+00> : vector<1x32xf32>
      %176 = tpu.matmul %174, %175, %cst_103 {dimension_numbers = #tpu.dot_dimension_numbers<[1], [0], [0], [1], [0, 0, 1, 1], [], []>} : vector<1x32xf32>, vector<32x32xf32>, vector<1x32xf32> -> vector<1x32xf32>
      %c0_104 = arith.constant 0 : index
      %c0_105 = arith.constant 0 : index
      %177 = vector.load %arg31[%c0_104, %c0_105] : memref<1x32xf32, #tpu.memory_space<vmem>>, vector<1x32xf32>
      %178 = arith.addf %176, %177 : vector<1x32xf32>
      %c0_106 = arith.constant 0 : index
      %c0_107 = arith.constant 0 : index
      %179 = vector.load %arg32[%c0_106, %c0_107] : memref<32x10xf32, #tpu.memory_space<vmem>>, vector<32x10xf32>
      %cst_108 = arith.constant dense<0.000000e+00> : vector<1x10xf32>
      %180 = tpu.matmul %178, %179, %cst_108 {dimension_numbers = #tpu.dot_dimension_numbers<[1], [0], [0], [1], [0, 0, 1, 1], [], []>} : vector<1x32xf32>, vector<32x10xf32>, vector<1x10xf32> -> vector<1x10xf32>
      %c0_109 = arith.constant 0 : index
      %c0_110 = arith.constant 0 : index
      %181 = vector.load %arg33[%c0_109, %c0_110] : memref<1x10xf32, #tpu.memory_space<vmem>>, vector<1x10xf32>
      %182 = arith.addf %180, %181 : vector<1x10xf32>
      %c0_111 = arith.constant 0 : index
      %c0_112 = arith.constant 0 : index
      %183 = vector.load %arg34[%c0_111, %c0_112] : memref<32x5xf32, #tpu.memory_space<vmem>>, vector<32x5xf32>
      %cst_113 = arith.constant dense<0.000000e+00> : vector<1x5xf32>
      %184 = tpu.matmul %178, %183, %cst_113 {dimension_numbers = #tpu.dot_dimension_numbers<[1], [0], [0], [1], [0, 0, 1, 1], [], []>} : vector<1x32xf32>, vector<32x5xf32>, vector<1x5xf32> -> vector<1x5xf32>
      %c0_114 = arith.constant 0 : index
      %c0_115 = arith.constant 0 : index
      %185 = vector.load %arg35[%c0_114, %c0_115] : memref<1x5xf32, #tpu.memory_space<vmem>>, vector<1x5xf32>
      %186 = arith.addf %184, %185 : vector<1x5xf32>
      %cst_116 = arith.constant dense<0xFF800000> : vector<1xf32>
      %187 = vector.multi_reduction <maximumf>, %186, %cst_116 [1] : vector<1x5xf32> to vector<1xf32>
      %188 = vector.shape_cast %187 : vector<1xf32> to vector<1x1xf32>
      %189 = vector.broadcast %188 : vector<1x1xf32> to vector<1x5xf32>
      %190 = arith.subf %186, %189 : vector<1x5xf32>
      %191 = math.exp %190 : vector<1x5xf32>
      %cst_117 = arith.constant dense<0.000000e+00> : vector<1xf32>
      %192 = vector.multi_reduction <add>, %191, %cst_117 [1] : vector<1x5xf32> to vector<1xf32>
      %193 = vector.shape_cast %192 : vector<1xf32> to vector<1x1xf32>
      %194 = vector.broadcast %193 : vector<1x1xf32> to vector<1x5xf32>
      %195 = arith.divf %191, %194 : vector<1x5xf32>
      %196 = tpu.concatenate %182, %195 in 1 : vector<1x10xf32>, vector<1x5xf32> -> vector<1x15xf32>
      %c0_118 = arith.constant 0 : index
      %c0_119 = arith.constant 0 : index
      %c0_120 = arith.constant 0 : index
      %197 = vector.load %arg36[%c0_118, %c0_119, %c0_120] : memref<1x1x15xf32, #tpu.memory_space<vmem>>, vector<1x1x15xf32>
      %198 = vector.shape_cast %197 : vector<1x1x15xf32> to vector<1x15xf32>
      %199 = vector.shape_cast %196 : vector<1x15xf32> to vector<1x1x15xf32>
      tpu.vector_store %arg36[%c0_118, %c0_119, %c0_120], %199 {strides = array<i32>} : memref<1x1x15xf32, #tpu.memory_space<vmem>>, vector<1x1x15xf32>,
    } else {
    }
    return
  }
  func.func @transform_0(%arg0: i32, %arg1: i32) -> (i32, i32, i32) {
    %c0_i32 = arith.constant 0 : i32
    %c0_i32_0 = arith.constant 0 : i32
    %c0_i32_1 = arith.constant 0 : i32
    return %arg0, %c0_i32, %c0_i32_0 : i32, i32, i32
  }
  func.func @transform_1(%arg0: i32, %arg1: i32) -> (i32, i32) {
    %c0_i32 = arith.constant 0 : i32
    %c0_i32_0 = arith.constant 0 : i32
    %c0_i32_1 = arith.constant 0 : i32
    return %c0_i32, %c0_i32_0 : i32, i32
  }
  func.func @transform_2(%arg0: i32, %arg1: i32) -> (i32, i32) {
    %c0_i32 = arith.constant 0 : i32
    %c0_i32_0 = arith.constant 0 : i32
    %c0_i32_1 = arith.constant 0 : i32
    return %c0_i32, %c0_i32_0 : i32, i32
  }
  func.func @transform_3(%arg0: i32, %arg1: i32) -> (i32, i32, i32) {
    %c0_i32 = arith.constant 0 : i32
    %c0_i32_0 = arith.constant 0 : i32
    %c0_i32_1 = arith.constant 0 : i32
    return %arg0, %c0_i32, %c0_i32_0 : i32, i32, i32
  }
  func.func @transform_4(%arg0: i32, %arg1: i32) -> (i32, i32) {
    %c0_i32 = arith.constant 0 : i32
    %c0_i32_0 = arith.constant 0 : i32
    %c0_i32_1 = arith.constant 0 : i32
    return %c0_i32, %c0_i32_0 : i32, i32
  }
  func.func @transform_5(%arg0: i32, %arg1: i32) -> (i32, i32) {
    %c0_i32 = arith.constant 0 : i32
    %c0_i32_0 = arith.constant 0 : i32
    %c0_i32_1 = arith.constant 0 : i32
    return %c0_i32, %c0_i32_0 : i32, i32
  }
  func.func @transform_6(%arg0: i32, %arg1: i32) -> (i32, i32, i32) {
    %c0_i32 = arith.constant 0 : i32
    %c0_i32_0 = arith.constant 0 : i32
    %c0_i32_1 = arith.constant 0 : i32
    return %arg1, %c0_i32, %c0_i32_0 : i32, i32, i32
  }
  func.func @transform_7(%arg0: i32, %arg1: i32) -> (i32, i32, i32) {
    %c0_i32 = arith.constant 0 : i32
    %c0_i32_0 = arith.constant 0 : i32
    %c0_i32_1 = arith.constant 0 : i32
    return %arg1, %c0_i32, %c0_i32_0 : i32, i32, i32
  }
  func.func @transform_8(%arg0: i32, %arg1: i32) -> (i32, i32, i32) {
    %c0_i32 = arith.constant 0 : i32
    %c0_i32_0 = arith.constant 0 : i32
    %c0_i32_1 = arith.constant 0 : i32
    return %arg1, %c0_i32, %c0_i32_0 : i32, i32, i32
  }
  func.func @transform_9(%arg0: i32, %arg1: i32) -> (i32, i32, i32) {
    %c0_i32 = arith.constant 0 : i32
    %c0_i32_0 = arith.constant 0 : i32
    %c0_i32_1 = arith.constant 0 : i32
    return %arg1, %c0_i32, %c0_i32_0 : i32, i32, i32
  }
  func.func @transform_10(%arg0: i32, %arg1: i32) -> (i32, i32, i32) {
    %c0_i32 = arith.constant 0 : i32
    %c0_i32_0 = arith.constant 0 : i32
    %c0_i32_1 = arith.constant 0 : i32
    return %arg1, %c0_i32, %c0_i32_0 : i32, i32, i32
  }
  func.func @transform_11(%arg0: i32, %arg1: i32) -> (i32, i32, i32) {
    %c0_i32 = arith.constant 0 : i32
    %c0_i32_0 = arith.constant 0 : i32
    %c0_i32_1 = arith.constant 0 : i32
    return %arg1, %c0_i32, %c0_i32_0 : i32, i32, i32
  }
  func.func @transform_12(%arg0: i32, %arg1: i32) -> (i32, i32, i32) {
    %c0_i32 = arith.constant 0 : i32
    %c0_i32_0 = arith.constant 0 : i32
    %c0_i32_1 = arith.constant 0 : i32
    return %arg1, %c0_i32, %c0_i32_0 : i32, i32, i32
  }
  func.func @transform_13(%arg0: i32, %arg1: i32) -> (i32, i32, i32) {
    %c0_i32 = arith.constant 0 : i32
    %c0_i32_0 = arith.constant 0 : i32
    %c0_i32_1 = arith.constant 0 : i32
    return %arg1, %c0_i32, %c0_i32_0 : i32, i32, i32
  }
  func.func @transform_14(%arg0: i32, %arg1: i32) -> (i32, i32, i32) {
    %c0_i32 = arith.constant 0 : i32
    %c0_i32_0 = arith.constant 0 : i32
    %c0_i32_1 = arith.constant 0 : i32
    return %arg1, %c0_i32, %c0_i32_0 : i32, i32, i32
  }
  func.func @transform_15(%arg0: i32, %arg1: i32) -> (i32, i32, i32) {
    %c0_i32 = arith.constant 0 : i32
    %c0_i32_0 = arith.constant 0 : i32
    %c0_i32_1 = arith.constant 0 : i32
    return %arg1, %c0_i32, %c0_i32_0 : i32, i32, i32
  }
  func.func @transform_16(%arg0: i32, %arg1: i32) -> (i32, i32, i32) {
    %c0_i32 = arith.constant 0 : i32
    %c0_i32_0 = arith.constant 0 : i32
    %c0_i32_1 = arith.constant 0 : i32
    return %arg1, %c0_i32, %c0_i32_0 : i32, i32, i32
  }
  func.func @transform_17(%arg0: i32, %arg1: i32) -> (i32, i32, i32) {
    %c0_i32 = arith.constant 0 : i32
    %c0_i32_0 = arith.constant 0 : i32
    %c0_i32_1 = arith.constant 0 : i32
    return %arg1, %c0_i32, %c0_i32_0 : i32, i32, i32
  }
  func.func @transform_18(%arg0: i32, %arg1: i32) -> (i32, i32, i32) {
    %c0_i32 = arith.constant 0 : i32
    %c0_i32_0 = arith.constant 0 : i32
    %c0_i32_1 = arith.constant 0 : i32
    return %arg0, %c0_i32, %c0_i32_0 : i32, i32, i32
  }
  func.func @transform_19(%arg0: i32, %arg1: i32) -> (i32, i32) {
    %c0_i32 = arith.constant 0 : i32
    %c0_i32_0 = arith.constant 0 : i32
    %c0_i32_1 = arith.constant 0 : i32
    return %c0_i32, %c0_i32_0 : i32, i32
  }
  func.func @transform_20(%arg0: i32, %arg1: i32) -> (i32, i32) {
    %c0_i32 = arith.constant 0 : i32
    %c0_i32_0 = arith.constant 0 : i32
    %c0_i32_1 = arith.constant 0 : i32
    return %c0_i32, %c0_i32_0 : i32, i32
  }
  func.func @transform_21(%arg0: i32, %arg1: i32) -> (i32, i32) {
    %c0_i32 = arith.constant 0 : i32
    %c0_i32_0 = arith.constant 0 : i32
    %c0_i32_1 = arith.constant 0 : i32
    return %c0_i32, %c0_i32_0 : i32, i32
  }
  func.func @transform_22(%arg0: i32, %arg1: i32) -> (i32, i32) {
    %c0_i32 = arith.constant 0 : i32
    %c0_i32_0 = arith.constant 0 : i32
    %c0_i32_1 = arith.constant 0 : i32
    return %c0_i32, %c0_i32_0 : i32, i32
  }
  func.func @transform_23(%arg0: i32, %arg1: i32) -> (i32, i32) {
    %c0_i32 = arith.constant 0 : i32
    %c0_i32_0 = arith.constant 0 : i32
    %c0_i32_1 = arith.constant 0 : i32
    return %c0_i32, %c0_i32_0 : i32, i32
  }
  func.func @transform_24(%arg0: i32, %arg1: i32) -> (i32, i32) {
    %c0_i32 = arith.constant 0 : i32
    %c0_i32_0 = arith.constant 0 : i32
    %c0_i32_1 = arith.constant 0 : i32
    return %c0_i32, %c0_i32_0 : i32, i32
  }
  func.func @transform_25(%arg0: i32, %arg1: i32) -> (i32, i32) {
    %c0_i32 = arith.constant 0 : i32
    %c0_i32_0 = arith.constant 0 : i32
    %c0_i32_1 = arith.constant 0 : i32
    return %c0_i32, %c0_i32_0 : i32, i32
  }
  func.func @transform_26(%arg0: i32, %arg1: i32) -> (i32, i32) {
    %c0_i32 = arith.constant 0 : i32
    %c0_i32_0 = arith.constant 0 : i32
    %c0_i32_1 = arith.constant 0 : i32
    return %c0_i32, %c0_i32_0 : i32, i32
  }
  func.func @transform_27(%arg0: i32, %arg1: i32) -> (i32, i32) {
    %c0_i32 = arith.constant 0 : i32
    %c0_i32_0 = arith.constant 0 : i32
    %c0_i32_1 = arith.constant 0 : i32
    return %c0_i32, %c0_i32_0 : i32, i32
  }
  func.func @transform_28(%arg0: i32, %arg1: i32) -> (i32, i32) {
    %c0_i32 = arith.constant 0 : i32
    %c0_i32_0 = arith.constant 0 : i32
    %c0_i32_1 = arith.constant 0 : i32
    return %c0_i32, %c0_i32_0 : i32, i32
  }
  func.func @transform_29(%arg0: i32, %arg1: i32) -> (i32, i32) {
    %c0_i32 = arith.constant 0 : i32
    %c0_i32_0 = arith.constant 0 : i32
    %c0_i32_1 = arith.constant 0 : i32
    return %c0_i32, %c0_i32_0 : i32, i32
  }
  func.func @transform_30(%arg0: i32, %arg1: i32) -> (i32, i32) {
    %c0_i32 = arith.constant 0 : i32
    %c0_i32_0 = arith.constant 0 : i32
    %c0_i32_1 = arith.constant 0 : i32
    return %c0_i32, %c0_i32_0 : i32, i32
  }
  func.func @transform_31(%arg0: i32, %arg1: i32) -> (i32, i32) {
    %c0_i32 = arith.constant 0 : i32
    %c0_i32_0 = arith.constant 0 : i32
    %c0_i32_1 = arith.constant 0 : i32
    return %c0_i32, %c0_i32_0 : i32, i32
  }
  func.func @transform_32(%arg0: i32, %arg1: i32) -> (i32, i32) {
    %c0_i32 = arith.constant 0 : i32
    %c0_i32_0 = arith.constant 0 : i32
    %c0_i32_1 = arith.constant 0 : i32
    return %c0_i32, %c0_i32_0 : i32, i32
  }
  func.func @transform_33(%arg0: i32, %arg1: i32) -> (i32, i32) {
    %c0_i32 = arith.constant 0 : i32
    %c0_i32_0 = arith.constant 0 : i32
    %c0_i32_1 = arith.constant 0 : i32
    return %c0_i32, %c0_i32_0 : i32, i32
  }
  func.func @transform_34(%arg0: i32, %arg1: i32) -> (i32, i32, i32) {
    %c0_i32 = arith.constant 0 : i32
    %c0_i32_0 = arith.constant 0 : i32
    %c0_i32_1 = arith.constant 0 : i32
    return %arg0, %c0_i32, %c0_i32_0 : i32, i32, i32
  }
}

</mosaic_0001>

<bundles_post_ra>
// kernel: multitask_bert_forward.1
= control target key start
LH: loop header
LB: loop body
LE: loop exit
PB: predicated region body
PF: predicated region fallthrough
CT: control target
= control target key end

     0   :  { %s2421_s6 = smov 1   ;;  %s2422_s10 = smov 2   ;;  %s2868_s0 = inlined_call_operand.smem [shape: u32[35], index: -1, kind: input, shape index: {}] }
   0x1   :  { %s2471_s5 = sld [smem:[%s2868_s0]]   ;;  %s2423_s14 = smov 3  }
   0x2   :  { %s2476_s9 = sld [smem:[%s2868_s0 + %s2421_s6]]   ;;  %s2424_s18 = smov 4  }
   0x3   :  { %s2481_s13 = sld [smem:[%s2868_s0 + %s2422_s10]]   ;;  %s2425_s22 = smov 5  }
   0x4   :  { %s2486_s17 = sld [smem:[%s2868_s0 + %s2423_s14]]   ;;  %s2426_s26 = smov 6  }
   0x5   :  { %s2491_s21 = sld [smem:[%s2868_s0 + %s2424_s18]]   ;;  %s2427_s30 = smov 7  }
   0x6   :  { %s2496_s25 = sld [smem:[%s2868_s0 + %s2425_s22]]   ;;  %s2428_s4 = smov 8  }
   0x7   :  { %2882 = sst [smem:[#allocation3_spill]] %s2471_s5  ;;  %s2429_s10 = smov 9  }
   0x8   :  { %2883 = sst [smem:[#allocation4_spill]] %s2476_s9  ;;  %s2430_s15 = smov 10  }
   0x9   :  { %2884 = sst [smem:[#allocation5_spill]] %s2481_s13  ;;  %s2431_s20 = smov 11  }
   0xa   :  { %2885 = sst [smem:[#allocation6_spill]] %s2486_s17  ;;  %s2433_s1 = smov 13  }
   0xb   :  { %2886 = sst [smem:[#allocation7_spill]] %s2491_s21  ;;  %s2434_s7 = smov 14  }
   0xc   :  { %2887 = sst [smem:[#allocation8_spill]] %s2496_s25  ;;  %s2436_s22 = smov 16  }
   0xd   :  { %s2501_s29 = sld [smem:[%s2868_s0 + %s2426_s26]]   ;;  %s2432_s26 = smov 12  }
   0xe   :  { %s2506_s3 = sld [smem:[%s2868_s0 + %s2427_s30]]   ;;  %s2437_s28 = smov 17  }
   0xf   :  { %s2511_s8 = sld [smem:[%s2868_s0 + %s2428_s4]]   ;;  %s2645_s16 = smov 0  }
  0x10   :  { %s2516_s14 = sld [smem:[%s2868_s0 + %s2429_s10]]   ;;  %s2647_s18 = smov 0  }
  0x11   :  { %s2521_s19 = sld [smem:[%s2868_s0 + %s2430_s15]]   ;;  %s2435_s15 = smov 15  }
  0x12   :  { %s2526_s24 = sld [smem:[%s2868_s0 + %s2431_s20]]   ;;  %s2651_s23 = smov 0  }
  0x13   :  { %2888 = sst [smem:[#allocation9_spill]] %s2501_s29 }
  0x14   :  { %s2531_s30 = sld [smem:[%s2868_s0 + %s2432_s26]]  }
  0x15   :  { %2889 = sst [smem:[#allocation10_spill]] %s2511_s8 }
  0x16   :  { %s2536_s6 = sld [smem:[%s2868_s0 + %s2433_s1]]  }
  0x17   :  { %s2541_s12 = sld [smem:[%s2868_s0 + %s2434_s7]]   ;;  %s2438_s7 = smov 18  }
  0x18   :  { %s2546_s20 = sld [smem:[%s2868_s0 + %s2435_s15]]   ;;  %s2439_s15 = smov 19  }
  0x19   :  { %s2551_s27 = sld [smem:[%s2868_s0 + %s2436_s22]]   ;;  %s2440_s22 = smov 20  }
  0x1a   :  { %s2556_s4 = sld [smem:[%s2868_s0 + %s2437_s28]]   ;;  %s2441_s28 = smov 21  }
  0x1b   :  { %s2561_s25 = sld [smem:[%s2868_s0 + %s2438_s7]]   ;;  %s2442_s7 = smov 22  }
  0x1c   :  { %s2566_s21 = sld [smem:[%s2868_s0 + %s2439_s15]]   ;;  %s2443_s15 = smov 23  }
  0x1d   :  { %s2571_s13 = sld [smem:[%s2868_s0 + %s2440_s22]]   ;;  %s2444_s22 = smov 24  }
  0x1e   :  { %s2576_s9 = sld [smem:[%s2868_s0 + %s2441_s28]]   ;;  %s2445_s28 = smov 25  }
  0x21   :  { %2890 = sst [smem:[#allocation11_spill]] %s2561_s25 }
  0x22   :  { %2891 = sst [smem:[#allocation12_spill]] %s2566_s21 }
  0x23   :  { %2892 = sst [smem:[#allocation13_spill]] %s2571_s13 }
  0x24   :  { %2893 = sst [smem:[#allocation14_spill]] %s2576_s9 }
  0x25   :  { %s2581_s25 = sld [smem:[%s2868_s0 + %s2442_s7]]   ;;  %s2446_s7 = smov 26  }
  0x26   :  { %s2586_s21 = sld [smem:[%s2868_s0 + %s2443_s15]]   ;;  %s2447_s15 = smov 27  }
  0x27   :  { %s2591_s13 = sld [smem:[%s2868_s0 + %s2444_s22]]   ;;  %s2448_s22 = smov 28  }
  0x28   :  { %s2596_s9 = sld [smem:[%s2868_s0 + %s2445_s28]]   ;;  %s2449_s28 = smov 29  }
  0x2b   :  { %2894 = sst [smem:[#allocation15_spill]] %s2581_s25 }
  0x2c   :  { %2895 = sst [smem:[#allocation16_spill]] %s2586_s21 }
  0x2d   :  { %2896 = sst [smem:[#allocation17_spill]] %s2591_s13 }
  0x2e   :  { %2897 = sst [smem:[#allocation18_spill]] %s2596_s9 }
  0x2f   :  { %s2601_s25 = sld [smem:[%s2868_s0 + %s2446_s7]]   ;;  %s2450_s7 = smov 30  }
  0x30   :  { %s2606_s21 = sld [smem:[%s2868_s0 + %s2447_s15]]   ;;  %s2451_s15 = smov 31  }
  0x31   :  { %s2611_s13 = sld [smem:[%s2868_s0 + %s2448_s22]]   ;;  %s2452_s22 = smov 32  }
  0x32   :  { %s2616_s9 = sld [smem:[%s2868_s0 + %s2449_s28]]   ;;  %s2453_s28 = smov 33  }
  0x35   :  { %2898 = sst [smem:[#allocation19_spill]] %s2601_s25 }
  0x36   :  { %2899 = sst [smem:[#allocation20_spill]] %s2606_s21 }
  0x37   :  { %2900 = sst [smem:[#allocation21_spill]] %s2611_s13 }
  0x38   :  { %2901 = sst [smem:[#allocation22_spill]] %s2616_s9 }
  0x39   :  { %s2621_s25 = sld [smem:[%s2868_s0 + %s2450_s7]]   ;;  %s2454_s7 = smov 34  }
  0x3a   :  { %s2626_s21 = sld [smem:[%s2868_s0 + %s2451_s15]]   ;;  %s2643_s15 = smov 0  }
  0x3b   :  { %s2631_s13 = sld [smem:[%s2868_s0 + %s2452_s22]]   ;;  %s2649_s22 = smov 0  }
  0x3c   :  { %s2636_s9 = sld [smem:[%s2868_s0 + %s2453_s28]]  }
  0x3f   :  { %2902 = sst [smem:[#allocation23_spill]] %s2621_s25 }
  0x40   :  { %2903 = sst [smem:[#allocation24_spill]] %s2626_s21 }
  0x41   :  { %2904 = sst [smem:[#allocation25_spill]] %s2631_s13 }
  0x42   :  { %2905 = sst [smem:[#allocation26_spill]] %s2636_s9 }
  0x43   :  { %s2641_s25 = sld [smem:[%s2868_s0 + %s2454_s7]]  }
  0x44 LB: > { %2906 = sst [smem:[#allocation27_spill]] %s2403_s15  ;;  %s88_s0 = sadd.s32 1, %s2411_s18  ;;  %s2419_s23 = sphi %s2651_s23, %s79_s23   ;;  %s2415_s22 = sphi %s2649_s22, %s2951_s22   ;;  %s2411_s18 = sphi %s2647_s18, %s2950_s18   ;;  %s2407_s16 = sphi %s2645_s16, %s2949_s16   ;;  %s2403_s15 = sphi %s2643_s15, %s2948_s15  }
  0x45   : > { %2907 = sst [smem:[#allocation28_spill]] %s2411_s18  ;;  %s91_s26 = sadd.s32 1, %s2415_s22 }
  0x46   : > { %2908 = sst [smem:[#allocation29_spill]] %s2415_s22  ;;  %p89_p0 = scmp.ge.s32.totalorder %s88_s0, 2 }
  0x47   : > { %2909 = sst [smem:[#allocation30_spill]] %s2419_s23  ;;  %p2224_p1 = scmp.ge.s32.totalorder %s2419_s23, 1 }
  0x48   : > { %p1078_p2 = scmp.lt.s32.totalorder %s2419_s23, 5  ;;  %s2953_s0 = smov (%p89_p0, %s88_s0), 0 }
  0x49   : > { %2910 = sst [smem:[#allocation31_spill]] %s2953_s0  ;;  %s2955_s26 = smov (!%p89_p0, %s91_s26), %s2415_s22 }
  0x4a   : > { %p1079_p3 = pnand %p2224_p1, %p1078_p2  ;;  %p93_p4 = scmp.ge.s32.totalorder %s2955_s26, 2 }
  0x4c   : > { %s2957_s26 = smov (%p93_p4, %s2955_s26), 0  ;;  %1082 = sbr.rel (%p1079_p3) target bundleno = 3582 (0xdfe), region = 156 }
  0x4d   : > { %2911 = sst [smem:[#allocation32_spill]] %s2957_s26 }
  0x51   : > { %p1211_p5 = scmp.lt.s32.totalorder %s2407_s16, 1  ;;  %s2913_s5 = sld [smem:[#allocation3_spill]] }
  0x52   : > { %s2914_s29 = sld [smem:[#allocation9_spill]]  ;;  %p1218_p6 = scmp.lt.s32.totalorder %s2403_s15, 1 }
  0x53   : > { %s2915_s8 = sld [smem:[#allocation10_spill]]  ;;  %s2959_s16 = smov (!%p1211_p5, %s2407_s16), 1 }
  0x54   : > { %s2679_s28 = scalar_select %p1218_p6, %s2403_s15, 1 }
  0x55   : > { %s2225_s1 = sshll.u32 %s2959_s16, 3  ;;  %s2916_s7 = sld [smem:[#allocation11_spill]] }
  0x56   : > { %s2258_s11 = sshll.u32 %s2679_s28, 5  ;;  %s1233_s18 = scalar_lea.vmem %s2516_s14, %s2679_s28 }
  0x57   : > { %s1214_s10 = scalar_lea.vmem %s2913_s5, %s2225_s1  ;;  %s1236_s23 = scalar_lea.vmem %s2521_s19, %s2679_s28 }
  0x58   : > { %s2687_s26 = scalar_lea.vmem %s2914_s29, %s2258_s11  ;;  %s1239_s21 = scalar_lea.vmem %s2526_s24, %s2679_s28 }
  0x59   : > { %2917 = sst [smem:[#allocation33_spill]] %s2687_s26  ;;  %s2692_s22 = scalar_lea.vmem %s2915_s8, %s2258_s11 }
  0x5a   : > { %2918 = sst [smem:[#allocation34_spill]] %s2692_s22  ;;  %s2701_s9 = scalar_lea.vmem %s2531_s30, %s2258_s11 }
  0x5b   : > { %s1247_s13 = scalar_lea.vmem %s2536_s6, %s2679_s28  ;;  %s2261_s15 = sshll.u32 %s2679_s28, 6 }
  0x5c   : > { %s1255_s2 = scalar_lea.vmem %s2546_s20, %s2679_s28  ;;  %s2709_s17 = scalar_lea.vmem %s2541_s12, %s2261_s15 }
  0x5d   : > { %s1258_s1 = scalar_lea.vmem %s2551_s27, %s2679_s28  ;;  %s1261_s5 = scalar_lea.vmem %s2556_s4, %s2679_s28 }
  0x5e   : > { %s1264_s29 = scalar_lea.vmem %s2916_s7, %s2959_s16  ;;  %s1267_s26 = scalar_lea.vmem %s2641_s25, %s2959_s16 }
  0x5f   : > { %s2919_s0 = sld [smem:[#allocation27_spill]] }
  0x65   : > { %p2234_p7 = scmp.ne.s32.totalorder %s2919_s0, 0 }
  0x66   : > { %s2920_s8 = sld [smem:[#allocation4_spill]] (!%p2234_p7) }
  0x67   : > { %1271 = sbr.rel (%p2234_p7) target bundleno = 383 (0x17f), region = 160  ;;  %s2921_s22 = sld [smem:[#allocation5_spill]] (!%p2234_p7) }
  0x68   : > { %s2923_s15 = sld [smem:[#allocation8_spill]] (!%p2234_p7) }
  0x6c   : > { %v1272_v0 = vld [vmem:[%s1214_s10] sm:$0xff]  ;;  %vm1282_vm0 = vcmask 261120   ;;  %v2455_v6 = vmov 32.0  }
  0x6d   : > { %v1273_v1 = vld [vmem:[%s2920_s8] sm:$0xff]  ;;  %2347 = vrcp.f32 %v2455_v6  ;;  %s2922_s8 = sld [smem:[#allocation7_spill]] }
  0x6e   : > { %v1274_v2 = vadd.f32 %v1273_v1, %v1272_v0  ;;  %v2344_v3 = vld [vmem:[%s2921_s22] ss:$0 sm:$0xff] }
  0x6f   : > { %v2346_v29 = vld [vmem:[%s2923_s15] ss:$0 sm:$0xff] }
  0x70   : > { %v1279_v4 = vadd.f32 %v2344_v3, %v1274_v2 }
  0x72   : > { %v1283_v5 = vsel %vm1282_vm0, %v1279_v4, 0.0 }
  0x73   : > { %1284 = vadd.xlane.f32.xlu0 %v1283_v5  ;;  %v2348_v7 = vpop.eup %2347  ;;  %v2345_v27 = vld [vmem:[%s2922_s8] ss:$0 sm:$0xff] }
  0x74   : > { %v1287_v8 = vmul.f32 32.0, %v2348_v7  ;;  %vm1291_vm1 = vweird.f32 %v2348_v7 }
  0x76   : > { %v1288_v9 = vsub.f32 1.0, %v1287_v8 }
  0x78   : > { %v1289_v10 = vmul.f32 %v2348_v7, %v1288_v9 }
  0x7a   : > { %v1290_v11 = vadd.f32 %v2348_v7, %v1289_v10 }
  0x7c   : > { %v1292_v12 = vsel %vm1291_vm1, %v2348_v7, %v1290_v11 }
  0xe6   : > { %v1285_v13 = vpop.xlane.xlu0 %1284 }
  0xe7   : > { %v1293_v14 = vmul.f32 %v1292_v12, %v1285_v13 }
  0xe9   : > { %v1294_v15 = vsub.f32 %v1279_v4, %v1293_v14 }
  0xeb   : > { %v1295_v16 = vmul.f32 %v1294_v15, %v1294_v15 }
  0xed   : > { %v1296_v17 = vsel %vm1282_vm0, %v1295_v16, 0.0 }
  0xee   : > { %1297 = vadd.xlane.f32.xlu0 %v1296_v17 }
 0x161   : > { %v1298_v18 = vpop.xlane.xlu0 %1297 }
 0x162   : > { %v1299_v19 = vmul.f32 %v1298_v18, %v1292_v12 }
 0x164   : > { %v1300_v20 = vadd.f32 1e-12, %v1299_v19 }
 0x166   : > { %2349 = vrsqrt.f32 %v1300_v20  ;;  %vm1307_vm3 = vweird.f32 %v1300_v20 }
 0x16c   : > { %v2350_v21 = vpop.eup %2349 }
 0x16d   : > { %v1302_v22 = vmul.f32 %v2350_v21, %v1300_v20  ;;  %vm1308_vm2 = vweird.f32 %v2350_v21 }
 0x16e   : > { %vm1309_vm4 = vmor %vm1307_vm3, %vm1308_vm2 }
 0x16f   : > { %v1303_v23 = vmul.f32 %v2350_v21, %v1302_v22 }
 0x171   : > { %v1304_v24 = vmul.f32 0.5, %v1303_v23 }
 0x173   : > { %v1305_v25 = vsub.f32 1.5, %v1304_v24 }
 0x175   : > { %v1306_v26 = vmul.f32 %v2350_v21, %v1305_v25 }
 0x177   : > { %v1310_v28 = vsel %vm1309_vm4, %v2350_v21, %v1306_v26 }
 0x178   : > { %v1311_v30 = vmul.f32 %v1310_v28, %v1294_v15 }
 0x17a   : > { %v1315_v31 = vmul.f32 %v2345_v27, %v1311_v30 }
 0x17c   : > { %v1319_v32 = vadd.f32 %v2346_v29, %v1315_v31 }
 0x17e   : > { %1320 = vst.msk [vmem:[#allocation2] sm:$0xff] %vm1282_vm0, %v1319_v32 }
 0x17f PF: > { %s2924_s22 = sld [smem:[#allocation33_spill]]  ;;  %vm1334_vm5 = vcmask 261120   ;;  %s2926_s7 = scalar_lea.vmem %s2506_s3, %s2679_s28  ;;  %vm1365_vm6 = vcmask 130048   ;;  %vm1395_vm7 = vcmask 64512   ;;  %vm1669_vm4 = vcmask 523264  }
 0x180   : > { %s2925_s0 = sld [smem:[#allocation6_spill]]  ;;  %v2351_v38 = vld [vmem:[%s2926_s7] ss:$0 sm:$0xff]  ;;  %s2456_s10 = smov 80  }
 0x181   : > { %s2457_s11 = smov 96   ;;  %s2458_s8 = smov 112  }
 0x182   : > { %s2928_s7 = sld [smem:[#allocation34_spill]] }
 0x185   : > { %v1329_v33 = vld [vmem:[%s2924_s22 + $0x18] sm:$0xff]  ;;  %v1328_v34 = vld [vmem:[%s2924_s22 + $0x10] sm:$0xff]  ;;  %v1327_v35 = vld [vmem:[%s2924_s22 + $0x8] sm:$0xff] }
 0x186   : > { %1350 = vmatpush.msra.mxu0 %v1329_v33  ;;  %v1326_v36 = vld [vmem:[%s2924_s22] sm:$0xff]  ;;  %s2927_s15 = scalar_lea.vmem %s2925_s0, %s2959_s16  ;;  %s2459_s22 = smov 48  }
 0x187   : > { %v2731_v37 = vld [vmem:[#allocation2] sm:$0xff]  ;;  %s2460_s0 = smov 64  }
 0x188   : > { %1351 = vmatpush.msra.mxu0 %v1328_v34  ;;  %v1322_v42 = vld [vmem:[%s2927_s15] sm:$0x1]  ;;  %v1359_v7 = vld [vmem:[%s2928_s7 + $0x8] sm:$0xff]  ;;  %v1361_v20 = vld [vmem:[%s2928_s7 + $0x18] sm:$0xff] }
 0x189   : > { %v1323_v43 = vcvt.s32.f32 %v1322_v42  ;;  %v1358_v9 = vld [vmem:[%s2928_s7] sm:$0xff]  ;;  %v1360_v21 = vld [vmem:[%s2928_s7 + $0x10] sm:$0xff] }
 0x18a   : > { %1352 = vmatpush.msra.mxu0 %v1327_v35  ;;  %v2352_v35 = vld [vmem:[%s1233_s18] ss:$0 sm:$0xff] }
 0x18b   : > { %v1324_v44 = vsub.f32 1.0, %v1323_v43  ;;  %v2461_v43 = vmov 32.0  }
 0x18c   : > { %1353 = vmatpush.msra.mxu0 %v1326_v36 }
 0x18d   : > { %2235 = vmatmul.msk.f32.vlgmr.msra.gmra.mxu0 %vm1334_vm5, %v2731_v37  ;;  %v1325_v45 = vmul.f32 -1e+09, %v1324_v44 }
 0x18f   : > { %v1392_v46 = vperm.slane %v1325_v45, 0 }
 0x20a   : > { %v1355_v39 = vpop.f32.mrf.mxu0 }
 0x20b   : > { %v1356_v40 = vadd.f32 %v2351_v38, %v1355_v39 }
 0x20d   : > { %1448 = vrot.lane.b32.xlu2 %v1356_v40, %s2456_s10  ;;  %1363 = vrot.lane.b32.xlu0 %v1356_v40, %s2457_s11 }
 0x215   : > { %1446 = vrot.lane.b32.xlu2 %v1356_v40, %s2458_s8 }
 0x267   : > { %v1449_v4 = vpop.permute.xlu2 %1448 }
 0x26f   : > { %v1447_v8 = vpop.permute.xlu2 %1446 }
 0x27f   : > { %v1364_v41 = vpop.permute.xlu0 %1363 }
 0x280   : > { %2236 = vmatpush.xpose.msk.msra.mxu1 %vm1365_vm6, %v1364_v41 }
 0x283   : > { %2237 = vmatmul.msk.f32.vlgmr.msra.gmra.mxu1 %vm1365_vm6, %v1356_v40 }
 0x284   : > { %1543 = vmatpush.msrb.mxu1 %v1361_v20 }
 0x286   : > { %1544 = vmatpush.msrb.mxu1 %v1360_v21 }
 0x300   : > { %v1387_v47 = vpop.f32.mrf.mxu1 }
 0x301   : > { %v1390_v48 = vmul.f32 0.25, %v1387_v47 }
 0x303   : > { %v1394_v49 = vadd.f32 %v1392_v46, %v1390_v48 }
 0x305   : > { %v1396_v50 = vsel %vm1395_vm7, %v1394_v49, -inf }
 0x306   : > { %1397 = vmax.xlane.f32.xlu0 %v1396_v50 }
 0x31a   : > { %1500 = vrot.lane.b32.xlu0 %v1356_v40, %s2459_s22 }
 0x379   : > { %v1398_v51 = vpop.xlane.xlu0 %1397 }
 0x37a   : > { %v1399_v52 = vsub.f32 %v1394_v49, %v1398_v51 }
 0x37c   : > { %v1400_v53 = vmul.f32 1.442695, %v1399_v52 }
 0x37e   : > { %2359 = vpow2.f32 %v1400_v53 }
 0x384   : > { %v2360_v54 = vpop.eup %2359 }
 0x385   : > { %v1402_v55 = vsel %vm1395_vm7, %v2360_v54, 0.0 }
 0x386   : > { %1403 = vadd.xlane.f32.xlu1 %v1402_v55  ;;  %v1619_v55 = vld [vmem:[%s2701_s9 + $0x10] sm:$0xff] }
 0x38c   : > { %v1501_v56 = vpop.permute.xlu0 %1500 }
 0x38d   : > { %1521 = vmatpush.msra.mxu2 %v1501_v56  ;;  %v1618_v56 = vld [vmem:[%s2701_s9 + $0x8] sm:$0xff] }
 0x39f   : > { %1420 = vrot.lane.b32.xlu1 %v1356_v40, %s2460_s0 }
 0x3f9   : > { %v1404_v57 = vpop.xlane.xlu1 %1403 }
 0x3fa   : > { %2361 = vrcp.f32 %v1404_v57  ;;  %v1416_v63 = vand.u32 2147483648, %v1404_v57  ;;  %vm1410_vm9 = vweird.f32 %v1404_v57  ;;  %v1414_v0 = vand.u32 2147483647, %v1404_v57 }
 0x3fc   : > { %v1417_v2 = vor.u32 1.1754944e-38, %v1416_v63  ;;  %vm1415_vm11 = vcmp.eq.f32.partialorder %v1414_v0, 8.507059e+37 }
 0x400   : > { %v2362_v58 = vpop.eup %2361 }
 0x401   : > { %v1406_v59 = vmul.f32 %v2362_v58, %v1404_v57  ;;  %vm1411_vm8 = vweird.f32 %v2362_v58  ;;  %v1617_v57 = vld [vmem:[%s2701_s9] sm:$0xff] }
 0x402   : > { %vm1412_vm10 = vmor %vm1410_vm9, %vm1411_vm8 }
 0x403   : > { %v1407_v60 = vsub.f32 1.0, %v1406_v59 }
 0x405   : > { %v1408_v61 = vmul.f32 %v2362_v58, %v1407_v60 }
 0x407   : > { %v1409_v62 = vadd.f32 %v2362_v58, %v1408_v61 }
 0x409   : > { %v1413_v1 = vsel %vm1412_vm10, %v2362_v58, %v1409_v62 }
 0x40a   : > { %v1418_v3 = vsel %vm1415_vm11, %v1417_v2, %v1413_v1 }
 0x40b   : > { %v1419_v6 = vmul.f32 %v2360_v54, %v1418_v3  ;;  %v1620_v54 = vld [vmem:[%s2701_s9 + $0x18] sm:$0xff]  ;;  %v2353_v3 = vld [vmem:[%s1236_s23] ss:$0 sm:$0xff]  ;;  %s2929_s9 = sld [smem:[#allocation27_spill]] }
 0x40c   : > { %1640 = vmatpush.msrb.mxu0 %v1620_v54 }
 0x40e   : > { %1641 = vmatpush.msrb.mxu0 %v1619_v55 }
 0x410   : > { %1642 = vmatpush.msrb.mxu0 %v1618_v56 }
 0x411   : > { %v1421_v5 = vpop.permute.xlu1 %1420  ;;  %p2246_p8 = scmp.ne.s32.totalorder %s2929_s9, 1 }
 0x412   : > { %1441 = vmatpush.msra.mxu3 %v1421_v5  ;;  %1643 = vmatpush.msrb.mxu0 %v1617_v57  ;;  %s2933_s18 = sld [smem:[#allocation12_spill]] (!%p2246_p8)  ;;  %s2462_s9 = smov (!%p2246_p8), 10  }
 0x413   : > { %2238 = vmatmul.msk.f32.vlgmr.msra.gmra.mxu3 %vm1395_vm7, %v1419_v6  ;;  %v2354_v6 = vld [vmem:[%s1239_s21] ss:$0 sm:$0xff]  ;;  %s2932_s21 = sld [smem:[#allocation16_spill]] (!%p2246_p8) }
 0x414   : > { %2239 = vmatpush.xpose.msk.msrb.mxu3 %vm1365_vm6, %v1449_v4  ;;  %s2936_s23 = sld [smem:[#allocation15_spill]] (!%p2246_p8) }
 0x415   : > { %s2938_s28 = sld [smem:[#allocation18_spill]] (!%p2246_p8) }
 0x416   : > { %s2940_s10 = sld [smem:[#allocation17_spill]] (!%p2246_p8) }
 0x417   : > { %s2941_s11 = sld [smem:[#allocation25_spill]] (!%p2246_p8) }
 0x418   : > { %1566 = vmatpush.msra.mxu3 %v1359_v7  ;;  %s2942_s8 = sld [smem:[#allocation23_spill]] (!%p2246_p8) }
 0x419   : > { %s2943_s15 = sld [smem:[#allocation20_spill]] (!%p2246_p8) }
 0x41a   : > { %1567 = vmatpush.msra.mxu3 %v1358_v9  ;;  %v1664_v9 = vld [vmem:[%s2709_s17 + $0x38] sm:$0xff]  ;;  %s2944_s22 = sld [smem:[#allocation22_spill]] (!%p2246_p8) }
 0x41b   : > { %2240 = vmatmul.msk.f32.vlgmr.msrb.gmra.mxu3 %vm1365_vm6, %v1447_v8  ;;  %1681 = vmatpush.msrb.mxu2 %v1664_v9  ;;  %s2945_s0 = sld [smem:[#allocation26_spill]] (!%p2246_p8) }
 0x41c   : > { %s2946_s7 = sld [smem:[#allocation24_spill]] (!%p2246_p8) }
 0x496   : > { %v1443_v10 = vpop.f32.mrf.mxu3 }
 0x497   : > { %2243 = vmatmul.msk.f32.vlgmr.msra.gmra.mxu3 %vm1365_vm6, %v1443_v10  ;;  %v1663_v10 = vld [vmem:[%s2709_s17 + $0x30] sm:$0xff] }
 0x498   : > { %1682 = vmatpush.msrb.mxu2 %v1663_v10 }
 0x49e   : > { %v1471_v11 = vpop.f32.mrf.mxu3 }
 0x49f   : > { %v1474_v12 = vmul.f32 0.25, %v1471_v11  ;;  %v1662_v11 = vld [vmem:[%s2709_s17 + $0x28] sm:$0xff] }
 0x4a0   : > { %1683 = vmatpush.msrb.mxu2 %v1662_v11 }
 0x4a1   : > { %v1475_v13 = vadd.f32 %v1474_v12, %v1392_v46  ;;  %v1661_v12 = vld [vmem:[%s2709_s17 + $0x20] sm:$0xff] }
 0x4a2   : > { %1684 = vmatpush.msrb.mxu2 %v1661_v12 }
 0x4a3   : > { %v1476_v14 = vsel %vm1395_vm7, %v1475_v13, -inf }
 0x4a4   : > { %1477 = vmax.xlane.f32.xlu2 %v1476_v14  ;;  %v1659_v14 = vld [vmem:[%s2709_s17 + $0x10] sm:$0xff] }
 0x517   : > { %v1478_v15 = vpop.xlane.xlu2 %1477 }
 0x518   : > { %v1479_v16 = vsub.f32 %v1475_v13, %v1478_v15  ;;  %v1660_v13 = vld [vmem:[%s2709_s17 + $0x18] sm:$0xff]  ;;  %v1658_v15 = vld [vmem:[%s2709_s17 + $0x8] sm:$0xff] }
 0x519   : > { %1685 = vmatpush.msrb.mxu2 %v1660_v13 }
 0x51a   : > { %v1480_v17 = vmul.f32 1.442695, %v1479_v16  ;;  %v1569_v36 = vpop.f32.mrf.mxu3  ;;  %v1657_v16 = vld [vmem:[%s2709_s17] sm:$0xff] }
 0x51b   : > { %1686 = vmatpush.msrb.mxu2 %v1659_v14 }
 0x51c   : > { %2363 = vpow2.f32 %v1480_v17  ;;  %v2355_v17 = vld [vmem:[%s1247_s13] ss:$0 sm:$0xff]  ;;  %s2930_s13 = sld [smem:[#allocation14_spill]] (!%p2246_p8) }
 0x51d   : > { %1687 = vmatpush.msrb.mxu2 %v1658_v15 }
 0x51f   : > { %1688 = vmatpush.msrb.mxu2 %v1657_v16 }
 0x522   : > { %v2364_v18 = vpop.eup %2363 }
 0x523   : > { %v1482_v19 = vsel %vm1395_vm7, %v2364_v18, 0.0 }
 0x524   : > { %1483 = vadd.xlane.f32.xlu1 %v1482_v19 }
 0x597   : > { %v1484_v22 = vpop.xlane.xlu1 %1483 }
 0x598   : > { %2365 = vrcp.f32 %v1484_v22  ;;  %v1496_v26 = vand.u32 2147483648, %v1484_v22  ;;  %v1494_v28 = vand.u32 2147483647, %v1484_v22  ;;  %vm1490_vm13 = vweird.f32 %v1484_v22 }
 0x599   : > { %2367 = vrcp.f32 %v2461_v43 }
 0x59a   : > { %v1497_v30 = vor.u32 1.1754944e-38, %v1496_v26  ;;  %vm1495_vm15 = vcmp.eq.f32.partialorder %v1494_v28, 8.507059e+37 }
 0x59e   : > { %v2366_v23 = vpop.eup %2365 }
 0x59f   : > { %v1486_v24 = vmul.f32 %v2366_v23, %v1484_v22  ;;  %vm1491_vm12 = vweird.f32 %v2366_v23  ;;  %v2368_v44 = vpop.eup %2367 }
 0x5a0   : > { %vm1492_vm14 = vmor %vm1490_vm13, %vm1491_vm12  ;;  %v1584_v45 = vmul.f32 32.0, %v2368_v44  ;;  %vm1588_vm0 = vweird.f32 %v2368_v44 }
 0x5a1   : > { %v1487_v25 = vsub.f32 1.0, %v1486_v24 }
 0x5a2   : > { %v1585_v46 = vsub.f32 1.0, %v1584_v45 }
 0x5a3   : > { %v1488_v27 = vmul.f32 %v2366_v23, %v1487_v25 }
 0x5a4   : > { %v1586_v47 = vmul.f32 %v2368_v44, %v1585_v46 }
 0x5a5   : > { %v1489_v29 = vadd.f32 %v2366_v23, %v1488_v27 }
 0x5a6   : > { %v1587_v48 = vadd.f32 %v2368_v44, %v1586_v47 }
 0x5a7   : > { %v1493_v31 = vsel %vm1492_vm14, %v2366_v23, %v1489_v29  ;;  %v2356_v29 = vld [vmem:[%s1255_s2] ss:$0 sm:$0xff]  ;;  %s2934_s2 = smov (!%p2246_p8), %s2933_s18 }
 0x5a8   : > { %v1498_v32 = vsel %vm1495_vm15, %v1497_v30, %v1493_v31  ;;  %v2762_v49 = vsel %vm1588_vm0, %v2368_v44, %v1587_v48 }
 0x5a9   : > { %v1499_v33 = vmul.f32 %v2364_v18, %v1498_v32 }
 0x5ab   : > { %2241 = vmatmul.msk.f32.vlgmr.msra.gmra.mxu2 %vm1395_vm7, %v1499_v33 }
 0x62e   : > { %v1523_v34 = vpop.f32.mrf.mxu2 }
 0x62f   : > { %2242 = vmatmul.msk.f32.vlgmr.msrb.gmra.mxu1 %vm1365_vm6, %v1523_v34 }
 0x6ac   : > { %v1546_v38 = vpop.f32.mrf.mxu1 }
 0x6ad   : > { %v1570_v39 = vadd.f32 %v1569_v36, %v1546_v38 }
 0x6af   : > { %v1576_v40 = vadd.f32 %v2352_v35, %v1570_v39 }
 0x6b1   : > { %v1577_v41 = vadd.f32 %v1576_v40, %v2731_v37 }
 0x6b3   : > { %v1580_v42 = vsel %vm1334_vm5, %v1577_v41, 0.0 }
 0x6b4   : > { %1581 = vadd.xlane.f32.xlu2 %v1580_v42 }
 0x727   : > { %v1582_v50 = vpop.xlane.xlu2 %1581 }
 0x728   : > { %v1590_v37 = vmul.f32 %v2762_v49, %v1582_v50  ;;  %v2357_v50 = vld [vmem:[%s1258_s1] ss:$0 sm:$0xff]  ;;  %s2939_s1 = sld [smem:[#allocation21_spill]] (!%p2246_p8) }
 0x72a   : > { %v1591_v51 = vsub.f32 %v1577_v41, %v1590_v37 }
 0x72c   : > { %v1592_v52 = vmul.f32 %v1591_v51, %v1591_v51 }
 0x72e   : > { %v1593_v53 = vsel %vm1334_vm5, %v1592_v52, 0.0 }
 0x72f   : > { %1594 = vadd.xlane.f32.xlu2 %v1593_v53 }
 0x7a2   : > { %v1595_v58 = vpop.xlane.xlu2 %1594 }
 0x7a3   : > { %v1596_v59 = vmul.f32 %v1595_v58, %v2762_v49 }
 0x7a5   : > { %v1597_v60 = vadd.f32 1e-12, %v1596_v59 }
 0x7a7   : > { %2369 = vrsqrt.f32 %v1597_v60  ;;  %vm1604_vm2 = vweird.f32 %v1597_v60 }
 0x7ad   : > { %v2370_v61 = vpop.eup %2369 }
 0x7ae   : > { %v1599_v62 = vmul.f32 %v2370_v61, %v1597_v60  ;;  %vm1605_vm1 = vweird.f32 %v2370_v61 }
 0x7af   : > { %vm1606_vm3 = vmor %vm1604_vm2, %vm1605_vm1 }
 0x7b0   : > { %v1600_v63 = vmul.f32 %v2370_v61, %v1599_v62 }
 0x7b2   : > { %v1601_v0 = vmul.f32 0.5, %v1600_v63 }
 0x7b4   : > { %v1602_v1 = vsub.f32 1.5, %v1601_v0 }
 0x7b6   : > { %v1603_v2 = vmul.f32 %v2370_v61, %v1602_v1 }
 0x7b8   : > { %v1607_v4 = vsel %vm1606_vm3, %v2370_v61, %v1603_v2 }
 0x7b9   : > { %v1608_v5 = vmul.f32 %v1607_v4, %v1591_v51  ;;  %v2358_v51 = vld [vmem:[%s1261_s5] ss:$0 sm:$0xff]  ;;  %s2935_s5 = sld [smem:[#allocation19_spill]] (!%p2246_p8) }
 0x7bb   : > { %v1612_v7 = vmul.f32 %v2353_v3, %v1608_v5 }
 0x7bd   : > { %v1616_v8 = vadd.f32 %v2354_v6, %v1612_v7 }
 0x7bf   : > { %2244 = vmatmul.msk.f32.vlgmr.msrb.gmra.mxu0 %vm1334_vm5, %v1616_v8 }
 0x83c   : > { %v1645_v18 = vpop.f32.mrf.mxu0 }
 0x83d   : > { %v1646_v19 = vadd.f32 %v2355_v17, %v1645_v18 }
 0x83f   : > { %v1649_v20 = vmul.f32 0.044715, %v1646_v19  ;;  %v1648_v26 = vmul.f32 0.5, %v1646_v19 }
 0x841   : > { %v1650_v21 = vmul.f32 %v1649_v20, %v1646_v19 }
 0x843   : > { %v1651_v22 = vmul.f32 %v1650_v21, %v1646_v19 }
 0x845   : > { %v1652_v23 = vadd.f32 %v1651_v22, %v1646_v19 }
 0x847   : > { %v1653_v24 = vmul.f32 0.7978846, %v1652_v23 }
 0x849   : > { %2371 = vtanh.f32 %v1653_v24 }
 0x84f   : > { %v2372_v25 = vpop.eup %2371 }
 0x850   : > { %v1655_v27 = vadd.f32 1.0, %v2372_v25 }
 0x852   : > { %v1656_v28 = vmul.f32 %v1655_v27, %v1648_v26 }
 0x854   : > { %2245 = vmatmul.msk.f32.vlgmr.msrb.gmra.mxu2 %vm1669_vm4, %v1656_v28 }
 0x8d7   : > { %v1690_v30 = vpop.f32.mrf.mxu2 }
 0x8d8   : > { %v1691_v31 = vadd.f32 %v2356_v29, %v1690_v30 }
 0x8da   : > { %v1693_v32 = vadd.f32 %v1691_v31, %v1616_v8 }
 0x8dc   : > { %v1696_v33 = vsel %vm1334_vm5, %v1693_v32, 0.0 }
 0x8dd   : > { %1697 = vadd.xlane.f32.xlu0 %v1696_v33 }
 0x950   : > { %v1698_v34 = vpop.xlane.xlu0 %1697 }
 0x951   : > { %v1699_v35 = vmul.f32 %v1698_v34, %v2762_v49 }
 0x953   : > { %v1700_v36 = vsub.f32 %v1693_v32, %v1699_v35 }
 0x955   : > { %v1701_v38 = vmul.f32 %v1700_v36, %v1700_v36 }
 0x957   : > { %v1702_v39 = vsel %vm1334_vm5, %v1701_v38, 0.0 }
 0x958   : > { %1703 = vadd.xlane.f32.xlu2 %v1702_v39 }
 0x9cb   : > { %v1704_v40 = vpop.xlane.xlu2 %1703 }
 0x9cc   : > { %v1705_v41 = vmul.f32 %v1704_v40, %v2762_v49 }
 0x9ce   : > { %v1706_v42 = vadd.f32 1e-12, %v1705_v41 }
 0x9d0   : > { %2373 = vrsqrt.f32 %v1706_v42  ;;  %vm1713_vm7 = vweird.f32 %v1706_v42 }
 0x9d6   : > { %v2374_v43 = vpop.eup %2373 }
 0x9d7   : > { %v1708_v44 = vmul.f32 %v2374_v43, %v1706_v42  ;;  %vm1714_vm6 = vweird.f32 %v2374_v43 }
 0x9d8   : > { %vm1715_vm8 = vmor %vm1713_vm7, %vm1714_vm6 }
 0x9d9   : > { %v1709_v45 = vmul.f32 %v2374_v43, %v1708_v44 }
 0x9db   : > { %v1710_v46 = vmul.f32 0.5, %v1709_v45 }
 0x9dd   : > { %v1711_v47 = vsub.f32 1.5, %v1710_v46 }
 0x9df   : > { %v1712_v48 = vmul.f32 %v2374_v43, %v1711_v47 }
 0x9e1   : > { %v1716_v37 = vsel %vm1715_vm8, %v2374_v43, %v1712_v48 }
 0x9e2   : > { %v1717_v52 = vmul.f32 %v1716_v37, %v1700_v36 }
 0x9e4   : > { %v1721_v53 = vmul.f32 %v2357_v50, %v1717_v52  ;;  %1730 = sbr.rel (%p2246_p8) target bundleno = 3582 (0xdfe), region = 164 }
 0x9e6   : > { %v1725_v54 = vadd.f32 %v2358_v51, %v1721_v53 }
 0x9e8   : > { %1726 = vst.msk [vmem:[#allocation2] sm:$0xff] %vm1334_vm5, %v1725_v54 }
 0x9e9   : > { %v1761_v49 = vld [vmem:[%s2930_s13] sm:$0x3f]  ;;  %vm1767_vm9 = vcmask 1045504   ;;  %vm1763_vm10 = vcmask 48128   ;;  %v1795_v56 = vld [vmem:[%s2932_s21 + $0x18] sm:$0xff]  ;;  %v1794_v57 = vld [vmem:[%s2932_s21 + $0x10] sm:$0xff] }
 0x9ea   : > { %v1760_v55 = vld [vmem:[%s1264_s29] sm:$0x1]  ;;  %2248 = vmatpush.msk.msra.mxu1 %vm1767_vm9, %v1761_v49  ;;  %1812 = vmatpush.msra.mxu2 %v1795_v56  ;;  %v1793_v58 = vld [vmem:[%s2932_s21 + $0x8] sm:$0xff]  ;;  %v1734_v59 = vld [vmem:[%s2933_s18 + $0x18] sm:$0xff]  ;;  %s2937_s29 = sld [smem:[#allocation13_spill]]  ;;  %vm1957_vm11 = vcmask 32768  }
 0x9eb   : > { %2249 = vmatmul.msk.f32.vlgmr.msra.gmra.mxu1 %vm1763_vm10, %v1760_v55  ;;  %1751 = vmatpush.msra.mxu0 %v1734_v59  ;;  %v1792_v60 = vld [vmem:[%s2932_s21] sm:$0xff]  ;;  %v1733_v61 = vld [vmem:[%s2934_s2 + $0x10] sm:$0xff]  ;;  %v1732_v62 = vld [vmem:[%s2934_s2 + $0x8] sm:$0xff]  ;;  %vm1986_vm15 = vcmask 80896   ;;  %vm1988_vm0 = vcmask 114688  }
 0x9ec   : > { %1813 = vmatpush.msra.mxu2 %v1794_v57  ;;  %v1827_v63 = vld [vmem:[%s2935_s5 + $0x18] sm:$0xff]  ;;  %v1731_v0 = vld [vmem:[%s2934_s2] sm:$0xff]  ;;  %v1826_v1 = vld [vmem:[%s2935_s5 + $0x10] sm:$0xff] }
 0x9ed   : > { %1752 = vmatpush.msra.mxu0 %v1733_v61  ;;  %1843 = vmatpush.msra.mxu3 %v1827_v63  ;;  %v1762_v2 = vld [vmem:[%s2936_s23] sm:$0x1]  ;;  %v1825_v8 = vld [vmem:[%s2935_s5 + $0x8] sm:$0xff]  ;;  %v1823_v10 = vld [vmem:[%s2938_s28 + $0x18] sm:$0xff] }
 0x9ee   : > { %1814 = vmatpush.msra.mxu2 %v1793_v58  ;;  %v1824_v11 = vld [vmem:[%s2935_s5] sm:$0xff]  ;;  %1866 = vmatpush.msrb.mxu1 %v1823_v10  ;;  %v1822_v12 = vld [vmem:[%s2938_s28 + $0x10] sm:$0xff]  ;;  %v1821_v13 = vld [vmem:[%s2938_s28 + $0x8] sm:$0xff] }
 0x9ef   : > { %1753 = vmatpush.msra.mxu0 %v1732_v62  ;;  %1844 = vmatpush.msra.mxu3 %v1826_v1  ;;  %v1879_v14 = vld [vmem:[%s2939_s1 + $0x18] sm:$0xff]  ;;  %v1878_v15 = vld [vmem:[%s2939_s1 + $0x10] sm:$0xff]  ;;  %v1820_v16 = vld [vmem:[%s2938_s28] sm:$0xff] }
 0x9f0   : > { %1815 = vmatpush.msra.mxu2 %v1792_v60  ;;  %v1735_v6 = vld [vmem:[%s2937_s29] sm:$0x1]  ;;  %1867 = vmatpush.msrb.mxu1 %v1822_v12  ;;  %v1877_v21 = vld [vmem:[%s2939_s1 + $0x8] sm:$0xff]  ;;  %v1935_v23 = vld [vmem:[%s2941_s11 + $0x18] sm:$0xff] }
 0x9f1   : > { %1754 = vmatpush.msra.mxu0 %v1731_v0  ;;  %1845 = vmatpush.msra.mxu3 %v1825_v8  ;;  %v1796_v18 = vld [vmem:[%s2940_s10] sm:$0x1]  ;;  %v1907_v24 = vld [vmem:[%s2942_s8 + $0x18] sm:$0xff]  ;;  %v1934_v25 = vld [vmem:[%s2941_s11 + $0x10] sm:$0xff] }
 0x9f2   : > { %2247 = vmatmul.msk.f32.vlgmr.msra.gmra.mxu0 %vm1334_vm5, %v1725_v54  ;;  %1868 = vmatpush.msrb.mxu1 %v1821_v13  ;;  %v1876_v22 = vld [vmem:[%s2939_s1] sm:$0xff]  ;;  %v1906_v26 = vld [vmem:[%s2942_s8 + $0x10] sm:$0xff]  ;;  %v1933_v27 = vld [vmem:[%s2941_s11 + $0x8] sm:$0xff] }
 0x9f3   : > { %1846 = vmatpush.msra.mxu3 %v1824_v11  ;;  %1896 = vmatpush.msrb.mxu0 %v1879_v14  ;;  %v1874_v30 = vld [vmem:[%s2943_s15] sm:$0x1]  ;;  %v1905_v33 = vld [vmem:[%s2942_s8 + $0x8] sm:$0xff] }
 0x9f4   : > { %1869 = vmatpush.msrb.mxu1 %v1820_v16  ;;  %1924 = vmatpush.msrb.mxu2 %v1907_v24  ;;  %v1932_v34 = vld [vmem:[%s2941_s11] sm:$0xff] }
 0x9f5   : > { %1897 = vmatpush.msrb.mxu0 %v1878_v15  ;;  %1949 = vmatpush.msrb.mxu3 %v1935_v23  ;;  %v1904_v35 = vld [vmem:[%s2942_s8] sm:$0xff] }
 0x9f6   : > { %1925 = vmatpush.msrb.mxu2 %v1906_v26  ;;  %v1880_v36 = vld [vmem:[%s2944_s22] sm:$0x1] }
 0x9f7   : > { %1898 = vmatpush.msrb.mxu0 %v1877_v21  ;;  %1950 = vmatpush.msrb.mxu3 %v1934_v25  ;;  %v1936_v40 = vld [vmem:[%s2945_s0] sm:$0x1] }
 0x9f8   : > { %1926 = vmatpush.msrb.mxu2 %v1905_v33  ;;  %v1908_v60 = vld [vmem:[%s2946_s7] sm:$0x1] }
 0x9f9   : > { %1899 = vmatpush.msrb.mxu0 %v1876_v22  ;;  %1951 = vmatpush.msrb.mxu3 %v1933_v27 }
 0x9fa   : > { %1927 = vmatpush.msrb.mxu2 %v1904_v35 }
 0x9fb   : > { %1952 = vmatpush.msrb.mxu3 %v1932_v34 }
 0xa68   : > { %v1788_v3 = vpop.f32.mrf.mxu1 }
 0xa69   : > { %v1789_v4 = vadd.f32 %v1788_v3, %v1762_v2 }
 0xa6b   : > { %v1791_v5 = vmax.f32 %v1789_v4, 0.0 }
 0xa6d   : > { %2250 = vmatmul.msk.f32.vlgmr.msra.gmra.mxu2 %vm1334_vm5, %v1791_v5 }
 0xa6f   : > { %v1756_v7 = vpop.f32.mrf.mxu0 }
 0xa70   : > { %v1757_v9 = vadd.f32 %v1756_v7, %v1735_v6 }
 0xa72   : > { %2375 = vtanh.f32 %v1757_v9 }
 0xa78   : > { %v2376_v17 = vpop.eup %2375 }
 0xa79   : > { %2252 = vmatmul.msk.f32.vlgmr.msrb.gmra.mxu1 %vm1334_vm5, %v2376_v17 }
 0xaf0   : > { %v1817_v19 = vpop.f32.mrf.mxu2 }
 0xaf1   : > { %v1818_v20 = vadd.f32 %v1817_v19, %v1796_v18 }
 0xaf3   : > { %2251 = vmatmul.msk.f32.vlgmr.msra.gmra.mxu3 %vm1334_vm5, %v1818_v20 }
 0xaf6   : > { %v1871_v28 = vpop.f32.mrf.mxu1 }
 0xb76   : > { %v1848_v29 = vpop.f32.mrf.mxu3 }
 0xb77   : > { %v1872_v31 = vadd.f32 %v1871_v28, %v1848_v29 }
 0xb79   : > { %v1875_v32 = vadd.f32 %v1874_v30, %v1872_v31 }
 0xb7b   : > { %2253 = vmatmul.msk.f32.vlgmr.msrb.gmra.mxu0 %vm1334_vm5, %v1875_v32 }
 0xbf8   : > { %v1901_v38 = vpop.f32.mrf.mxu0 }
 0xbf9   : > { %v1902_v39 = vadd.f32 %v1901_v38, %v1880_v36 }
 0xbfb   : > { %2254 = vmatmul.msk.f32.vlgmr.msrb.gmra.mxu2 %vm1334_vm5, %v1902_v39  ;;  %2255 = vmatmul.msk.f32.vlgmr.msrb.gmra.mxu3 %vm1334_vm5, %v1902_v39 }
 0xc7e   : > { %v1954_v41 = vpop.f32.mrf.mxu3  ;;  %v1929_v61 = vpop.f32.mrf.mxu2 }
 0xc7f   : > { %v1955_v42 = vadd.f32 %v1954_v41, %v1936_v40  ;;  %v1930_v62 = vadd.f32 %v1929_v61, %v1908_v60 }
 0xc81   : > { %v1958_v43 = vsel %vm1957_vm11, %v1955_v42, -inf }
 0xc82   : > { %1959 = vmax.xlane.f32.xlu0 %v1958_v43 }
 0xcf5   : > { %v1960_v44 = vpop.xlane.xlu0 %1959 }
 0xcf6   : > { %v1961_v45 = vsub.f32 %v1955_v42, %v1960_v44 }
 0xcf8   : > { %v1962_v46 = vmul.f32 1.442695, %v1961_v45 }
 0xcfa   : > { %2377 = vpow2.f32 %v1962_v46 }
 0xd00   : > { %v2378_v47 = vpop.eup %2377 }
 0xd01   : > { %v1964_v48 = vsel %vm1957_vm11, %v2378_v47, 0.0 }
 0xd02   : > { %1965 = vadd.xlane.f32.xlu0 %v1964_v48 }
 0xd75   : > { %v1966_v50 = vpop.xlane.xlu0 %1965 }
 0xd76   : > { %2379 = vrcp.f32 %v1966_v50  ;;  %v1978_v53 = vand.u32 2147483648, %v1966_v50  ;;  %v1976_v49 = vand.u32 2147483647, %v1966_v50  ;;  %vm1972_vm12 = vweird.f32 %v1966_v50 }
 0xd78   : > { %v1979_v56 = vor.u32 1.1754944e-38, %v1978_v53  ;;  %vm1977_vm14 = vcmp.eq.f32.partialorder %v1976_v49, 8.507059e+37 }
 0xd7c   : > { %v2380_v37 = vpop.eup %2379 }
 0xd7d   : > { %v1968_v51 = vmul.f32 %v2380_v37, %v1966_v50  ;;  %vm1973_vm5 = vweird.f32 %v2380_v37 }
 0xd7e   : > { %vm1974_vm13 = vmor %vm1972_vm12, %vm1973_vm5 }
 0xd7f   : > { %v1969_v52 = vsub.f32 1.0, %v1968_v51 }
 0xd81   : > { %v1970_v54 = vmul.f32 %v2380_v37, %v1969_v52 }
 0xd83   : > { %v1971_v55 = vadd.f32 %v2380_v37, %v1970_v54 }
 0xd85   : > { %v1975_v57 = vsel %vm1974_vm13, %v2380_v37, %v1971_v55 }
 0xd86   : > { %v1980_v58 = vsel %vm1977_vm14, %v1979_v56, %v1975_v57 }
 0xd87   : > { %v1981_v59 = vmul.f32 %v2378_v47, %v1980_v58 }
 0xd89   : > { %1983 = vrot.lane.b32.xlu1 %v1981_v59, %s2462_s9 }
 0xdfb   : > { %v1984_v63 = vpop.permute.xlu1 %1983 }
 0xdfc   : > { %v1987_v0 = vsel %vm1986_vm15, %v1930_v62, %v1984_v63 }
 0xdfd   : > { %1989 = vst.msk [vmem:[%s1267_s26] sm:$0x1] %vm1988_vm0, %v1987_v0 }
 0xdfe PF: > { %s2947_s13 = sld [smem:[#allocation30_spill]] }
 0xdff   : > { %s2948_s15 = sld [smem:[#allocation28_spill]] }
 0xe00   : > { %s2949_s16 = sld [smem:[#allocation29_spill]] }
 0xe01   : > { %s2950_s18 = sld [smem:[#allocation31_spill]] }
 0xe02   : > { %s2951_s22 = sld [smem:[#allocation32_spill]] }
 0xe04   : > { %s79_s23 = sadd.s32 1, %s2947_s13  }
 0xe05   : > { %p76_p9 = scmp.ge.s32.totalorder %s79_s23, 6  }
 0xe07   :  { %78 = sbr.rel (!%p76_p9) target bundleno = 68 (0x44), region = 270 }

</bundles_post_ra>
